<compile_context>
chip_gen: v5e
topology: v5e:2x2
jax: 0.10.0
libtpu: 0.0.40
codegen_flags: <defaults>
</compile_context>

<pallas_src>
import functools

import jax
import jax.numpy as jnp
from jax.experimental import pallas as pl
from jax.experimental.pallas import tpu as pltpu

EPS = 1e-5
K = 3  # Conv1d kernel size


# --------------------------------------------------------------------------
# Fused kernel
# --------------------------------------------------------------------------
def _model_kernel(layer_dims, batch, x_ref, *refs):
    """Fused forward pass.

    layer_dims : tuple of (ci, co, l_in) per conv layer (static).
    batch      : static batch size N.
    x_ref      : VMEM f32[(Ci0*N, L0)]   input slab, row = ci*N + n
    refs per layer l:
      w_l : VMEM f32[(Ci*K, Co*N, 1)]    BN-folded conv weights (sublane cols)
      b_l : VMEM f32[(Co*N, 1)]          BN-folded conv bias
    then:
      fcw : VMEM f32[(C_last, L_last, F)]  BN-folded FC weights, per channel
      fcb : VMEM f32[(1, F)]               BN-folded FC bias
      out : VMEM f32[(N, F)]
    """
    n_layers = len(layer_dims)
    n = batch
    conv_refs = refs[: 2 * n_layers]
    fcw_ref = refs[2 * n_layers]
    fcb_ref = refs[2 * n_layers + 1]
    out_ref = refs[2 * n_layers + 2]

    acts = x_ref[...]  # (Ci0*N, L0), row = ci*N + n

    for l in range(n_layers):
        ci_n, co_n, l_in = layer_dims[l]
        l_out = l_in - (K - 1)
        w_ref, b_ref = conv_refs[2 * l], conv_refs[2 * l + 1]
        w_all = w_ref[...]                                        # (Ci*K, Co*N, 1)

        # Start from the (BN-folded) bias, broadcast across lanes.
        acc = jnp.broadcast_to(b_ref[...], (co_n * n, l_out))     # (Co*N, l_out)

        for ci in range(ci_n):
            # Per input channel: (N, l_in) rows, replicated along sublanes so
            # a single VPU op covers all Co output channels at once.
            x_ci = acts[ci * n:(ci + 1) * n, :]                   # (N, l_in)
            x_t = jnp.concatenate([x_ci] * co_n, axis=0)          # (Co*N, l_in)
            for k in range(K):
                # w_all[ci*K+k] is a per-sublane weight column (Co*N, 1);
                # broadcast-mul against the lane-shifted slice.
                acc = acc + w_all[ci * K + k] * x_t[:, k:k + l_out]

        acts = jnp.maximum(acc, 0.0)  # ReLU; the BN affine is folded downstream.

    # Final Linear: per-channel (N, L_last) @ (L_last, F) dots -> no
    # lane-misaligned concat-flatten.  BN of the last layer already folded in.
    c_last = layer_dims[-1][1]
    logits = jnp.broadcast_to(fcb_ref[...], (n, fcb_ref.shape[1]))  # (N, F)
    for c in range(c_last):
        a_c = acts[c * n:(c + 1) * n, :]                           # (N, L_last)
        logits = logits + jnp.dot(a_c, fcw_ref[c],
                                  preferred_element_type=jnp.float32)

    # F.softmax on 2-D input -> softmax over dim=1
    m = jnp.max(logits, axis=1, keepdims=True)
    e = jnp.exp(logits - m)
    out_ref[...] = e / jnp.sum(e, axis=1, keepdims=True)


# --------------------------------------------------------------------------
# Parameters (torch-like raw params), BN folding + kernel-layout packing
# --------------------------------------------------------------------------
def init_raw_params(key, input_size=2, input_length=64, out_features=6,
                    hidden=4, n_layers=5):
    """Deterministic synthetic parameters mirroring the torch module shapes."""
    keys = jax.random.split(key, n_layers + 1)
    conv = []
    c_in, length = input_size, input_length
    for l in range(n_layers):
        c_out = hidden
        k1, k2, k3, k4, k5, k6 = jax.random.split(keys[l], 6)
        w = 0.3 * jax.random.normal(k1, (c_out, c_in, K), jnp.float32)
        b = 0.1 * jax.random.normal(k2, (c_out,), jnp.float32)
        gamma = 1.0 + 0.1 * jax.random.normal(k3, (c_out,), jnp.float32)
        beta = 0.1 * jax.random.normal(k4, (c_out,), jnp.float32)
        mean = 0.1 * jax.random.normal(k5, (c_out,), jnp.float32)
        var = 0.5 + jax.random.uniform(k6, (c_out,), jnp.float32)
        scale = gamma / jnp.sqrt(var + EPS)       # BN inference scale
        shift = beta - mean * scale               # BN inference shift
        conv.append((w, b, scale, shift))
        c_in, length = c_out, length - (K - 1)

    flat_dim = c_in * length                      # 4 * (input_length - 10)
    kw, kb = jax.random.split(keys[-1])
    fc_w = 0.1 * jax.random.normal(kw, (out_features, flat_dim), jnp.float32)
    fc_b = 0.1 * jax.random.normal(kb, (out_features,), jnp.float32)
    return {"conv": conv, "fc_w": fc_w, "fc_b": fc_b,
            "input_length": input_length}


def fold_and_pack(raw, batch):
    """Fold BN affines downstream and pack weights into kernel layout."""
    conv = raw["conv"]
    n_layers = len(conv)
    length = raw["input_length"]
    layer_dims = []
    packed_conv = []
    for l in range(n_layers):
        w, b, _, _ = conv[l]                       # (Co, Ci, K), (Co,)
        co, ci, k = w.shape
        layer_dims.append((ci, co, length))
        if l == 0:
            w_f, b_f = w, b
        else:
            # Fold previous layer's BN (y = s*relu + t) into this conv.
            _, _, s_p, t_p = conv[l - 1]
            w_f = w * s_p[None, :, None]
            b_f = b + jnp.einsum("ock,c->o", w, t_p)
        # Layout (Ci*K, Co*N, 1): [ci*K+k, co*N+n] = w_f[co, ci, k]
        w_slab = jnp.transpose(w_f, (1, 2, 0)).reshape(ci * k, co)
        w_slab = jnp.repeat(w_slab, batch, axis=1)[:, :, None]
        b_slab = jnp.repeat(b_f, batch)[:, None]                   # (Co*N, 1)
        packed_conv.append((w_slab, b_slab))
        length = length - (k - 1)

    # Fold last layer's BN into the FC weights/bias.
    _, _, s_last, t_last = conv[-1]
    fc_w, fc_b = raw["fc_w"], raw["fc_b"]                          # (F, C*L), (F,)
    co_last = conv[-1][0].shape[0]
    l_last = fc_w.shape[1] // co_last
    fc_w3 = fc_w.reshape(fc_w.shape[0], co_last, l_last)           # (F, C, L)
    fcb_f = fc_b + jnp.einsum("fcl,c->f", fc_w3, t_last)
    fcw_f = fc_w3 * s_last[None, :, None]
    fcw_slab = jnp.transpose(fcw_f, (1, 2, 0))                     # (C, L, F)

    return {"layer_dims": tuple(layer_dims), "conv": packed_conv,
            "fcw": fcw_slab, "fcb": fcb_f[None, :]}


# --------------------------------------------------------------------------
# Wrapper
# --------------------------------------------------------------------------
def basic_model_forward(x, packed):
    layer_dims = packed["layer_dims"]
    n, c0, l0 = x.shape
    out_features = packed["fcw"].shape[-1]

    # NCL -> channel-major sublane slab (C*N, L), row = c*N + n (layout
    # plumbing done wrapper-side; free relative to the kernel).
    x_slab = jnp.transpose(x, (1, 0, 2)).reshape(c0 * n, l0).astype(jnp.float32)

    args = [x_slab]
    for w_slab, b_slab in packed["conv"]:
        args += [w_slab, b_slab]
    args += [packed["fcw"], packed["fcb"]]

    in_specs = [pl.BlockSpec(memory_space=pltpu.MemorySpace.VMEM)
                for _ in args]

    # Tiny cost hint so XLA schedules this micro-kernel sensibly.
    flops = 0
    for (ci, co, l_in) in layer_dims:
        flops += 2 * n * co * ci * K * (l_in - (K - 1))
    flops += 2 * n * packed["fcw"].shape[0] * packed["fcw"].shape[1] * out_features
    bytes_accessed = sum(int(a.size) * 4 for a in args) + n * out_features * 4
    cost = pl.CostEstimate(flops=flops, transcendentals=n * out_features,
                           bytes_accessed=bytes_accessed)

    kernel = functools.partial(_model_kernel, layer_dims, n)
    return pl.pallas_call(
        kernel,
        out_shape=jax.ShapeDtypeStruct((n, out_features), jnp.float32),
        in_specs=in_specs,
        out_specs=pl.BlockSpec(memory_space=pltpu.MemorySpace.VMEM),
        cost_estimate=cost,
    )(*args)


# --------------------------------------------------------------------------
# Pure-JAX reference (exact torch op order: Conv -> ReLU -> BN, ..., FC, softmax)
# --------------------------------------------------------------------------
def reference_forward(x, raw):
    y = x.astype(jnp.float32)                     # (N, C, L)
    for (w, b, s, t) in raw["conv"]:
        l_out = y.shape[2] - (w.shape[2] - 1)
        out = jnp.zeros((y.shape[0], w.shape[0], l_out), jnp.float32)
        out = out + b[None, :, None]
        for k in range(w.shape[2]):
            out = out + jnp.einsum("ncl,oc->nol", y[:, :, k:k + l_out], w[:, :, k])
        out = jnp.maximum(out, 0.0)
        y = out * s[None, :, None] + t[None, :, None]
    flat = y.reshape(y.shape[0], -1)              # nn.Flatten (channel-major)
    logits = flat @ raw["fc_w"].T + raw["fc_b"][None, :]
    return jax.nn.softmax(logits, axis=1)


if __name__ == "__main__":
    key = jax.random.PRNGKey(0)
    kx, kp = jax.random.split(key)

    # Shapes implied by the module defaults: (batch=2, input_size=2, input_length=64)
    N, C_IN, L_IN, F_OUT = 2, 2, 64, 6
    x = jax.random.normal(kx, (N, C_IN, L_IN), jnp.float32)

    raw = init_raw_params(kp, input_size=C_IN, input_length=L_IN,
                          out_features=F_OUT)
    packed = fold_and_pack(raw, N)                # BN folding: trace/prep time

    out = basic_model_forward(x, packed)
    out = jax.block_until_ready(out)

    ref = reference_forward(x, raw)

    assert out.shape == (N, F_OUT), out.shape
    assert bool(jnp.all(jnp.isfinite(out)))
    assert bool(jnp.all(jnp.abs(jnp.sum(out, axis=1) - 1.0) < 1e-4))
    assert bool(jnp.allclose(out, ref, atol=1e-4, rtol=1e-4))
    print("KERNEL_OK")
</pallas_src>

<mosaic_0001>
module attributes {stable_mosaic.version = 11 : i64} {
  func.func @_model_kernel(%arg0: memref<4x64xf32, #tpu.memory_space<vmem>>, %arg1: memref<6x8x1xf32, #tpu.memory_space<vmem>>, %arg2: memref<8x1xf32, #tpu.memory_space<vmem>>, %arg3: memref<12x8x1xf32, #tpu.memory_space<vmem>>, %arg4: memref<8x1xf32, #tpu.memory_space<vmem>>, %arg5: memref<12x8x1xf32, #tpu.memory_space<vmem>>, %arg6: memref<8x1xf32, #tpu.memory_space<vmem>>, %arg7: memref<12x8x1xf32, #tpu.memory_space<vmem>>, %arg8: memref<8x1xf32, #tpu.memory_space<vmem>>, %arg9: memref<12x8x1xf32, #tpu.memory_space<vmem>>, %arg10: memref<8x1xf32, #tpu.memory_space<vmem>>, %arg11: memref<4x54x6xf32, #tpu.memory_space<vmem>>, %arg12: memref<1x6xf32, #tpu.memory_space<vmem>>, %arg13: memref<2x6xf32, #tpu.memory_space<vmem>>) attributes {dimension_semantics = [], scalar_prefetch = 0 : i64, scratch_operands = 0 : i64, tpu.core_type = #tpu.core_type<tc>} {
    %c0 = arith.constant 0 : index
    %c0_0 = arith.constant 0 : index
    %0 = vector.load %arg0[%c0, %c0_0] : memref<4x64xf32, #tpu.memory_space<vmem>>, vector<4x64xf32>
    %c0_1 = arith.constant 0 : index
    %c0_2 = arith.constant 0 : index
    %c0_3 = arith.constant 0 : index
    %1 = vector.load %arg1[%c0_1, %c0_2, %c0_3] : memref<6x8x1xf32, #tpu.memory_space<vmem>>, vector<6x8x1xf32>
    %c0_4 = arith.constant 0 : index
    %c0_5 = arith.constant 0 : index
    %2 = vector.load %arg2[%c0_4, %c0_5] : memref<8x1xf32, #tpu.memory_space<vmem>>, vector<8x1xf32>
    %3 = vector.shape_cast %2 : vector<8x1xf32> to vector<8x1xf32>
    %4 = vector.broadcast %3 : vector<8x1xf32> to vector<8x62xf32>
    %5 = vector.extract_strided_slice %0 {offsets = [0, 0], sizes = [2, 64], strides = [1, 1]} : vector<4x64xf32> to vector<2x64xf32>
    %6 = tpu.concatenate %5, %5, %5, %5 in 0 : vector<2x64xf32>, vector<2x64xf32>, vector<2x64xf32>, vector<2x64xf32> -> vector<8x64xf32>
    %7 = vector.extract_strided_slice %1 {offsets = [0, 0, 0], sizes = [1, 8, 1], strides = [1, 1, 1]} : vector<6x8x1xf32> to vector<1x8x1xf32>
    %8 = vector.shape_cast %7 : vector<1x8x1xf32> to vector<8x1xf32>
    %9 = vector.extract_strided_slice %6 {offsets = [0, 0], sizes = [8, 62], strides = [1, 1]} : vector<8x64xf32> to vector<8x62xf32>
    %10 = vector.broadcast %8 : vector<8x1xf32> to vector<8x62xf32>
    %11 = arith.mulf %10, %9 : vector<8x62xf32>
    %12 = arith.addf %4, %11 : vector<8x62xf32>
    %13 = vector.extract_strided_slice %1 {offsets = [1, 0, 0], sizes = [1, 8, 1], strides = [1, 1, 1]} : vector<6x8x1xf32> to vector<1x8x1xf32>
    %14 = vector.shape_cast %13 : vector<1x8x1xf32> to vector<8x1xf32>
    %15 = vector.extract_strided_slice %6 {offsets = [0, 1], sizes = [8, 62], strides = [1, 1]} : vector<8x64xf32> to vector<8x62xf32>
    %16 = vector.broadcast %14 : vector<8x1xf32> to vector<8x62xf32>
    %17 = arith.mulf %16, %15 : vector<8x62xf32>
    %18 = arith.addf %12, %17 : vector<8x62xf32>
    %19 = vector.extract_strided_slice %1 {offsets = [2, 0, 0], sizes = [1, 8, 1], strides = [1, 1, 1]} : vector<6x8x1xf32> to vector<1x8x1xf32>
    %20 = vector.shape_cast %19 : vector<1x8x1xf32> to vector<8x1xf32>
    %21 = vector.extract_strided_slice %6 {offsets = [0, 2], sizes = [8, 62], strides = [1, 1]} : vector<8x64xf32> to vector<8x62xf32>
    %22 = vector.broadcast %20 : vector<8x1xf32> to vector<8x62xf32>
    %23 = arith.mulf %22, %21 : vector<8x62xf32>
    %24 = arith.addf %18, %23 : vector<8x62xf32>
    %25 = vector.extract_strided_slice %0 {offsets = [2, 0], sizes = [2, 64], strides = [1, 1]} : vector<4x64xf32> to vector<2x64xf32>
    %26 = tpu.concatenate %25, %25, %25, %25 in 0 : vector<2x64xf32>, vector<2x64xf32>, vector<2x64xf32>, vector<2x64xf32> -> vector<8x64xf32>
    %27 = vector.extract_strided_slice %1 {offsets = [3, 0, 0], sizes = [1, 8, 1], strides = [1, 1, 1]} : vector<6x8x1xf32> to vector<1x8x1xf32>
    %28 = vector.shape_cast %27 : vector<1x8x1xf32> to vector<8x1xf32>
    %29 = vector.extract_strided_slice %26 {offsets = [0, 0], sizes = [8, 62], strides = [1, 1]} : vector<8x64xf32> to vector<8x62xf32>
    %30 = vector.broadcast %28 : vector<8x1xf32> to vector<8x62xf32>
    %31 = arith.mulf %30, %29 : vector<8x62xf32>
    %32 = arith.addf %24, %31 : vector<8x62xf32>
    %33 = vector.extract_strided_slice %1 {offsets = [4, 0, 0], sizes = [1, 8, 1], strides = [1, 1, 1]} : vector<6x8x1xf32> to vector<1x8x1xf32>
    %34 = vector.shape_cast %33 : vector<1x8x1xf32> to vector<8x1xf32>
    %35 = vector.extract_strided_slice %26 {offsets = [0, 1], sizes = [8, 62], strides = [1, 1]} : vector<8x64xf32> to vector<8x62xf32>
    %36 = vector.broadcast %34 : vector<8x1xf32> to vector<8x62xf32>
    %37 = arith.mulf %36, %35 : vector<8x62xf32>
    %38 = arith.addf %32, %37 : vector<8x62xf32>
    %39 = vector.extract_strided_slice %1 {offsets = [5, 0, 0], sizes = [1, 8, 1], strides = [1, 1, 1]} : vector<6x8x1xf32> to vector<1x8x1xf32>
    %40 = vector.shape_cast %39 : vector<1x8x1xf32> to vector<8x1xf32>
    %41 = vector.extract_strided_slice %26 {offsets = [0, 2], sizes = [8, 62], strides = [1, 1]} : vector<8x64xf32> to vector<8x62xf32>
    %42 = vector.broadcast %40 : vector<8x1xf32> to vector<8x62xf32>
    %43 = arith.mulf %42, %41 : vector<8x62xf32>
    %44 = arith.addf %38, %43 : vector<8x62xf32>
    %cst = arith.constant 0.000000e+00 : f32
    %45 = vector.broadcast %cst : f32 to vector<8x62xf32>
    %46 = arith.maximumf %44, %45 : vector<8x62xf32>
    %c0_6 = arith.constant 0 : index
    %c0_7 = arith.constant 0 : index
    %c0_8 = arith.constant 0 : index
    %47 = vector.load %arg3[%c0_6, %c0_7, %c0_8] : memref<12x8x1xf32, #tpu.memory_space<vmem>>, vector<12x8x1xf32>
    %c0_9 = arith.constant 0 : index
    %c0_10 = arith.constant 0 : index
    %48 = vector.load %arg4[%c0_9, %c0_10] : memref<8x1xf32, #tpu.memory_space<vmem>>, vector<8x1xf32>
    %49 = vector.shape_cast %48 : vector<8x1xf32> to vector<8x1xf32>
    %50 = vector.broadcast %49 : vector<8x1xf32> to vector<8x60xf32>
    %51 = vector.extract_strided_slice %46 {offsets = [0, 0], sizes = [2, 62], strides = [1, 1]} : vector<8x62xf32> to vector<2x62xf32>
    %52 = tpu.concatenate %51, %51, %51, %51 in 0 : vector<2x62xf32>, vector<2x62xf32>, vector<2x62xf32>, vector<2x62xf32> -> vector<8x62xf32>
    %53 = vector.extract_strided_slice %47 {offsets = [0, 0, 0], sizes = [1, 8, 1], strides = [1, 1, 1]} : vector<12x8x1xf32> to vector<1x8x1xf32>
    %54 = vector.shape_cast %53 : vector<1x8x1xf32> to vector<8x1xf32>
    %55 = vector.extract_strided_slice %52 {offsets = [0, 0], sizes = [8, 60], strides = [1, 1]} : vector<8x62xf32> to vector<8x60xf32>
    %56 = vector.broadcast %54 : vector<8x1xf32> to vector<8x60xf32>
    %57 = arith.mulf %56, %55 : vector<8x60xf32>
    %58 = arith.addf %50, %57 : vector<8x60xf32>
    %59 = vector.extract_strided_slice %47 {offsets = [1, 0, 0], sizes = [1, 8, 1], strides = [1, 1, 1]} : vector<12x8x1xf32> to vector<1x8x1xf32>
    %60 = vector.shape_cast %59 : vector<1x8x1xf32> to vector<8x1xf32>
    %61 = vector.extract_strided_slice %52 {offsets = [0, 1], sizes = [8, 60], strides = [1, 1]} : vector<8x62xf32> to vector<8x60xf32>
    %62 = vector.broadcast %60 : vector<8x1xf32> to vector<8x60xf32>
    %63 = arith.mulf %62, %61 : vector<8x60xf32>
    %64 = arith.addf %58, %63 : vector<8x60xf32>
    %65 = vector.extract_strided_slice %47 {offsets = [2, 0, 0], sizes = [1, 8, 1], strides = [1, 1, 1]} : vector<12x8x1xf32> to vector<1x8x1xf32>
    %66 = vector.shape_cast %65 : vector<1x8x1xf32> to vector<8x1xf32>
    %67 = vector.extract_strided_slice %52 {offsets = [0, 2], sizes = [8, 60], strides = [1, 1]} : vector<8x62xf32> to vector<8x60xf32>
    %68 = vector.broadcast %66 : vector<8x1xf32> to vector<8x60xf32>
    %69 = arith.mulf %68, %67 : vector<8x60xf32>
    %70 = arith.addf %64, %69 : vector<8x60xf32>
    %71 = vector.extract_strided_slice %46 {offsets = [2, 0], sizes = [2, 62], strides = [1, 1]} : vector<8x62xf32> to vector<2x62xf32>
    %72 = tpu.concatenate %71, %71, %71, %71 in 0 : vector<2x62xf32>, vector<2x62xf32>, vector<2x62xf32>, vector<2x62xf32> -> vector<8x62xf32>
    %73 = vector.extract_strided_slice %47 {offsets = [3, 0, 0], sizes = [1, 8, 1], strides = [1, 1, 1]} : vector<12x8x1xf32> to vector<1x8x1xf32>
    %74 = vector.shape_cast %73 : vector<1x8x1xf32> to vector<8x1xf32>
    %75 = vector.extract_strided_slice %72 {offsets = [0, 0], sizes = [8, 60], strides = [1, 1]} : vector<8x62xf32> to vector<8x60xf32>
    %76 = vector.broadcast %74 : vector<8x1xf32> to vector<8x60xf32>
    %77 = arith.mulf %76, %75 : vector<8x60xf32>
    %78 = arith.addf %70, %77 : vector<8x60xf32>
    %79 = vector.extract_strided_slice %47 {offsets = [4, 0, 0], sizes = [1, 8, 1], strides = [1, 1, 1]} : vector<12x8x1xf32> to vector<1x8x1xf32>
    %80 = vector.shape_cast %79 : vector<1x8x1xf32> to vector<8x1xf32>
    %81 = vector.extract_strided_slice %72 {offsets = [0, 1], sizes = [8, 60], strides = [1, 1]} : vector<8x62xf32> to vector<8x60xf32>
    %82 = vector.broadcast %80 : vector<8x1xf32> to vector<8x60xf32>
    %83 = arith.mulf %82, %81 : vector<8x60xf32>
    %84 = arith.addf %78, %83 : vector<8x60xf32>
    %85 = vector.extract_strided_slice %47 {offsets = [5, 0, 0], sizes = [1, 8, 1], strides = [1, 1, 1]} : vector<12x8x1xf32> to vector<1x8x1xf32>
    %86 = vector.shape_cast %85 : vector<1x8x1xf32> to vector<8x1xf32>
    %87 = vector.extract_strided_slice %72 {offsets = [0, 2], sizes = [8, 60], strides = [1, 1]} : vector<8x62xf32> to vector<8x60xf32>
    %88 = vector.broadcast %86 : vector<8x1xf32> to vector<8x60xf32>
    %89 = arith.mulf %88, %87 : vector<8x60xf32>
    %90 = arith.addf %84, %89 : vector<8x60xf32>
    %91 = vector.extract_strided_slice %46 {offsets = [4, 0], sizes = [2, 62], strides = [1, 1]} : vector<8x62xf32> to vector<2x62xf32>
    %92 = tpu.concatenate %91, %91, %91, %91 in 0 : vector<2x62xf32>, vector<2x62xf32>, vector<2x62xf32>, vector<2x62xf32> -> vector<8x62xf32>
    %93 = vector.extract_strided_slice %47 {offsets = [6, 0, 0], sizes = [1, 8, 1], strides = [1, 1, 1]} : vector<12x8x1xf32> to vector<1x8x1xf32>
    %94 = vector.shape_cast %93 : vector<1x8x1xf32> to vector<8x1xf32>
    %95 = vector.extract_strided_slice %92 {offsets = [0, 0], sizes = [8, 60], strides = [1, 1]} : vector<8x62xf32> to vector<8x60xf32>
    %96 = vector.broadcast %94 : vector<8x1xf32> to vector<8x60xf32>
    %97 = arith.mulf %96, %95 : vector<8x60xf32>
    %98 = arith.addf %90, %97 : vector<8x60xf32>
    %99 = vector.extract_strided_slice %47 {offsets = [7, 0, 0], sizes = [1, 8, 1], strides = [1, 1, 1]} : vector<12x8x1xf32> to vector<1x8x1xf32>
    %100 = vector.shape_cast %99 : vector<1x8x1xf32> to vector<8x1xf32>
    %101 = vector.extract_strided_slice %92 {offsets = [0, 1], sizes = [8, 60], strides = [1, 1]} : vector<8x62xf32> to vector<8x60xf32>
    %102 = vector.broadcast %100 : vector<8x1xf32> to vector<8x60xf32>
    %103 = arith.mulf %102, %101 : vector<8x60xf32>
    %104 = arith.addf %98, %103 : vector<8x60xf32>
    %105 = vector.extract_strided_slice %47 {offsets = [8, 0, 0], sizes = [1, 8, 1], strides = [1, 1, 1]} : vector<12x8x1xf32> to vector<1x8x1xf32>
    %106 = vector.shape_cast %105 : vector<1x8x1xf32> to vector<8x1xf32>
    %107 = vector.extract_strided_slice %92 {offsets = [0, 2], sizes = [8, 60], strides = [1, 1]} : vector<8x62xf32> to vector<8x60xf32>
    %108 = vector.broadcast %106 : vector<8x1xf32> to vector<8x60xf32>
    %109 = arith.mulf %108, %107 : vector<8x60xf32>
    %110 = arith.addf %104, %109 : vector<8x60xf32>
    %111 = vector.extract_strided_slice %46 {offsets = [6, 0], sizes = [2, 62], strides = [1, 1]} : vector<8x62xf32> to vector<2x62xf32>
    %112 = tpu.concatenate %111, %111, %111, %111 in 0 : vector<2x62xf32>, vector<2x62xf32>, vector<2x62xf32>, vector<2x62xf32> -> vector<8x62xf32>
    %113 = vector.extract_strided_slice %47 {offsets = [9, 0, 0], sizes = [1, 8, 1], strides = [1, 1, 1]} : vector<12x8x1xf32> to vector<1x8x1xf32>
    %114 = vector.shape_cast %113 : vector<1x8x1xf32> to vector<8x1xf32>
    %115 = vector.extract_strided_slice %112 {offsets = [0, 0], sizes = [8, 60], strides = [1, 1]} : vector<8x62xf32> to vector<8x60xf32>
    %116 = vector.broadcast %114 : vector<8x1xf32> to vector<8x60xf32>
    %117 = arith.mulf %116, %115 : vector<8x60xf32>
    %118 = arith.addf %110, %117 : vector<8x60xf32>
    %119 = vector.extract_strided_slice %47 {offsets = [10, 0, 0], sizes = [1, 8, 1], strides = [1, 1, 1]} : vector<12x8x1xf32> to vector<1x8x1xf32>
    %120 = vector.shape_cast %119 : vector<1x8x1xf32> to vector<8x1xf32>
    %121 = vector.extract_strided_slice %112 {offsets = [0, 1], sizes = [8, 60], strides = [1, 1]} : vector<8x62xf32> to vector<8x60xf32>
    %122 = vector.broadcast %120 : vector<8x1xf32> to vector<8x60xf32>
    %123 = arith.mulf %122, %121 : vector<8x60xf32>
    %124 = arith.addf %118, %123 : vector<8x60xf32>
    %125 = vector.extract_strided_slice %47 {offsets = [11, 0, 0], sizes = [1, 8, 1], strides = [1, 1, 1]} : vector<12x8x1xf32> to vector<1x8x1xf32>
    %126 = vector.shape_cast %125 : vector<1x8x1xf32> to vector<8x1xf32>
    %127 = vector.extract_strided_slice %112 {offsets = [0, 2], sizes = [8, 60], strides = [1, 1]} : vector<8x62xf32> to vector<8x60xf32>
    %128 = vector.broadcast %126 : vector<8x1xf32> to vector<8x60xf32>
    %129 = arith.mulf %128, %127 : vector<8x60xf32>
    %130 = arith.addf %124, %129 : vector<8x60xf32>
    %cst_11 = arith.constant 0.000000e+00 : f32
    %131 = vector.broadcast %cst_11 : f32 to vector<8x60xf32>
    %132 = arith.maximumf %130, %131 : vector<8x60xf32>
    %c0_12 = arith.constant 0 : index
    %c0_13 = arith.constant 0 : index
    %c0_14 = arith.constant 0 : index
    %133 = vector.load %arg5[%c0_12, %c0_13, %c0_14] : memref<12x8x1xf32, #tpu.memory_space<vmem>>, vector<12x8x1xf32>
    %c0_15 = arith.constant 0 : index
    %c0_16 = arith.constant 0 : index
    %134 = vector.load %arg6[%c0_15, %c0_16] : memref<8x1xf32, #tpu.memory_space<vmem>>, vector<8x1xf32>
    %135 = vector.shape_cast %134 : vector<8x1xf32> to vector<8x1xf32>
    %136 = vector.broadcast %135 : vector<8x1xf32> to vector<8x58xf32>
    %137 = vector.extract_strided_slice %132 {offsets = [0, 0], sizes = [2, 60], strides = [1, 1]} : vector<8x60xf32> to vector<2x60xf32>
    %138 = tpu.concatenate %137, %137, %137, %137 in 0 : vector<2x60xf32>, vector<2x60xf32>, vector<2x60xf32>, vector<2x60xf32> -> vector<8x60xf32>
    %139 = vector.extract_strided_slice %133 {offsets = [0, 0, 0], sizes = [1, 8, 1], strides = [1, 1, 1]} : vector<12x8x1xf32> to vector<1x8x1xf32>
    %140 = vector.shape_cast %139 : vector<1x8x1xf32> to vector<8x1xf32>
    %141 = vector.extract_strided_slice %138 {offsets = [0, 0], sizes = [8, 58], strides = [1, 1]} : vector<8x60xf32> to vector<8x58xf32>
    %142 = vector.broadcast %140 : vector<8x1xf32> to vector<8x58xf32>
    %143 = arith.mulf %142, %141 : vector<8x58xf32>
    %144 = arith.addf %136, %143 : vector<8x58xf32>
    %145 = vector.extract_strided_slice %133 {offsets = [1, 0, 0], sizes = [1, 8, 1], strides = [1, 1, 1]} : vector<12x8x1xf32> to vector<1x8x1xf32>
    %146 = vector.shape_cast %145 : vector<1x8x1xf32> to vector<8x1xf32>
    %147 = vector.extract_strided_slice %138 {offsets = [0, 1], sizes = [8, 58], strides = [1, 1]} : vector<8x60xf32> to vector<8x58xf32>
    %148 = vector.broadcast %146 : vector<8x1xf32> to vector<8x58xf32>
    %149 = arith.mulf %148, %147 : vector<8x58xf32>
    %150 = arith.addf %144, %149 : vector<8x58xf32>
    %151 = vector.extract_strided_slice %133 {offsets = [2, 0, 0], sizes = [1, 8, 1], strides = [1, 1, 1]} : vector<12x8x1xf32> to vector<1x8x1xf32>
    %152 = vector.shape_cast %151 : vector<1x8x1xf32> to vector<8x1xf32>
    %153 = vector.extract_strided_slice %138 {offsets = [0, 2], sizes = [8, 58], strides = [1, 1]} : vector<8x60xf32> to vector<8x58xf32>
    %154 = vector.broadcast %152 : vector<8x1xf32> to vector<8x58xf32>
    %155 = arith.mulf %154, %153 : vector<8x58xf32>
    %156 = arith.addf %150, %155 : vector<8x58xf32>
    %157 = vector.extract_strided_slice %132 {offsets = [2, 0], sizes = [2, 60], strides = [1, 1]} : vector<8x60xf32> to vector<2x60xf32>
    %158 = tpu.concatenate %157, %157, %157, %157 in 0 : vector<2x60xf32>, vector<2x60xf32>, vector<2x60xf32>, vector<2x60xf32> -> vector<8x60xf32>
    %159 = vector.extract_strided_slice %133 {offsets = [3, 0, 0], sizes = [1, 8, 1], strides = [1, 1, 1]} : vector<12x8x1xf32> to vector<1x8x1xf32>
    %160 = vector.shape_cast %159 : vector<1x8x1xf32> to vector<8x1xf32>
    %161 = vector.extract_strided_slice %158 {offsets = [0, 0], sizes = [8, 58], strides = [1, 1]} : vector<8x60xf32> to vector<8x58xf32>
    %162 = vector.broadcast %160 : vector<8x1xf32> to vector<8x58xf32>
    %163 = arith.mulf %162, %161 : vector<8x58xf32>
    %164 = arith.addf %156, %163 : vector<8x58xf32>
    %165 = vector.extract_strided_slice %133 {offsets = [4, 0, 0], sizes = [1, 8, 1], strides = [1, 1, 1]} : vector<12x8x1xf32> to vector<1x8x1xf32>
    %166 = vector.shape_cast %165 : vector<1x8x1xf32> to vector<8x1xf32>
    %167 = vector.extract_strided_slice %158 {offsets = [0, 1], sizes = [8, 58], strides = [1, 1]} : vector<8x60xf32> to vector<8x58xf32>
    %168 = vector.broadcast %166 : vector<8x1xf32> to vector<8x58xf32>
    %169 = arith.mulf %168, %167 : vector<8x58xf32>
    %170 = arith.addf %164, %169 : vector<8x58xf32>
    %171 = vector.extract_strided_slice %133 {offsets = [5, 0, 0], sizes = [1, 8, 1], strides = [1, 1, 1]} : vector<12x8x1xf32> to vector<1x8x1xf32>
    %172 = vector.shape_cast %171 : vector<1x8x1xf32> to vector<8x1xf32>
    %173 = vector.extract_strided_slice %158 {offsets = [0, 2], sizes = [8, 58], strides = [1, 1]} : vector<8x60xf32> to vector<8x58xf32>
    %174 = vector.broadcast %172 : vector<8x1xf32> to vector<8x58xf32>
    %175 = arith.mulf %174, %173 : vector<8x58xf32>
    %176 = arith.addf %170, %175 : vector<8x58xf32>
    %177 = vector.extract_strided_slice %132 {offsets = [4, 0], sizes = [2, 60], strides = [1, 1]} : vector<8x60xf32> to vector<2x60xf32>
    %178 = tpu.concatenate %177, %177, %177, %177 in 0 : vector<2x60xf32>, vector<2x60xf32>, vector<2x60xf32>, vector<2x60xf32> -> vector<8x60xf32>
    %179 = vector.extract_strided_slice %133 {offsets = [6, 0, 0], sizes = [1, 8, 1], strides = [1, 1, 1]} : vector<12x8x1xf32> to vector<1x8x1xf32>
    %180 = vector.shape_cast %179 : vector<1x8x1xf32> to vector<8x1xf32>
    %181 = vector.extract_strided_slice %178 {offsets = [0, 0], sizes = [8, 58], strides = [1, 1]} : vector<8x60xf32> to vector<8x58xf32>
    %182 = vector.broadcast %180 : vector<8x1xf32> to vector<8x58xf32>
    %183 = arith.mulf %182, %181 : vector<8x58xf32>
    %184 = arith.addf %176, %183 : vector<8x58xf32>
    %185 = vector.extract_strided_slice %133 {offsets = [7, 0, 0], sizes = [1, 8, 1], strides = [1, 1, 1]} : vector<12x8x1xf32> to vector<1x8x1xf32>
    %186 = vector.shape_cast %185 : vector<1x8x1xf32> to vector<8x1xf32>
    %187 = vector.extract_strided_slice %178 {offsets = [0, 1], sizes = [8, 58], strides = [1, 1]} : vector<8x60xf32> to vector<8x58xf32>
    %188 = vector.broadcast %186 : vector<8x1xf32> to vector<8x58xf32>
    %189 = arith.mulf %188, %187 : vector<8x58xf32>
    %190 = arith.addf %184, %189 : vector<8x58xf32>
    %191 = vector.extract_strided_slice %133 {offsets = [8, 0, 0], sizes = [1, 8, 1], strides = [1, 1, 1]} : vector<12x8x1xf32> to vector<1x8x1xf32>
    %192 = vector.shape_cast %191 : vector<1x8x1xf32> to vector<8x1xf32>
    %193 = vector.extract_strided_slice %178 {offsets = [0, 2], sizes = [8, 58], strides = [1, 1]} : vector<8x60xf32> to vector<8x58xf32>
    %194 = vector.broadcast %192 : vector<8x1xf32> to vector<8x58xf32>
    %195 = arith.mulf %194, %193 : vector<8x58xf32>
    %196 = arith.addf %190, %195 : vector<8x58xf32>
    %197 = vector.extract_strided_slice %132 {offsets = [6, 0], sizes = [2, 60], strides = [1, 1]} : vector<8x60xf32> to vector<2x60xf32>
    %198 = tpu.concatenate %197, %197, %197, %197 in 0 : vector<2x60xf32>, vector<2x60xf32>, vector<2x60xf32>, vector<2x60xf32> -> vector<8x60xf32>
    %199 = vector.extract_strided_slice %133 {offsets = [9, 0, 0], sizes = [1, 8, 1], strides = [1, 1, 1]} : vector<12x8x1xf32> to vector<1x8x1xf32>
    %200 = vector.shape_cast %199 : vector<1x8x1xf32> to vector<8x1xf32>
    %201 = vector.extract_strided_slice %198 {offsets = [0, 0], sizes = [8, 58], strides = [1, 1]} : vector<8x60xf32> to vector<8x58xf32>
    %202 = vector.broadcast %200 : vector<8x1xf32> to vector<8x58xf32>
    %203 = arith.mulf %202, %201 : vector<8x58xf32>
    %204 = arith.addf %196, %203 : vector<8x58xf32>
    %205 = vector.extract_strided_slice %133 {offsets = [10, 0, 0], sizes = [1, 8, 1], strides = [1, 1, 1]} : vector<12x8x1xf32> to vector<1x8x1xf32>
    %206 = vector.shape_cast %205 : vector<1x8x1xf32> to vector<8x1xf32>
    %207 = vector.extract_strided_slice %198 {offsets = [0, 1], sizes = [8, 58], strides = [1, 1]} : vector<8x60xf32> to vector<8x58xf32>
    %208 = vector.broadcast %206 : vector<8x1xf32> to vector<8x58xf32>
    %209 = arith.mulf %208, %207 : vector<8x58xf32>
    %210 = arith.addf %204, %209 : vector<8x58xf32>
    %211 = vector.extract_strided_slice %133 {offsets = [11, 0, 0], sizes = [1, 8, 1], strides = [1, 1, 1]} : vector<12x8x1xf32> to vector<1x8x1xf32>
    %212 = vector.shape_cast %211 : vector<1x8x1xf32> to vector<8x1xf32>
    %213 = vector.extract_strided_slice %198 {offsets = [0, 2], sizes = [8, 58], strides = [1, 1]} : vector<8x60xf32> to vector<8x58xf32>
    %214 = vector.broadcast %212 : vector<8x1xf32> to vector<8x58xf32>
    %215 = arith.mulf %214, %213 : vector<8x58xf32>
    %216 = arith.addf %210, %215 : vector<8x58xf32>
    %cst_17 = arith.constant 0.000000e+00 : f32
    %217 = vector.broadcast %cst_17 : f32 to vector<8x58xf32>
    %218 = arith.maximumf %216, %217 : vector<8x58xf32>
    %c0_18 = arith.constant 0 : index
    %c0_19 = arith.constant 0 : index
    %c0_20 = arith.constant 0 : index
    %219 = vector.load %arg7[%c0_18, %c0_19, %c0_20] : memref<12x8x1xf32, #tpu.memory_space<vmem>>, vector<12x8x1xf32>
    %c0_21 = arith.constant 0 : index
    %c0_22 = arith.constant 0 : index
    %220 = vector.load %arg8[%c0_21, %c0_22] : memref<8x1xf32, #tpu.memory_space<vmem>>, vector<8x1xf32>
    %221 = vector.shape_cast %220 : vector<8x1xf32> to vector<8x1xf32>
    %222 = vector.broadcast %221 : vector<8x1xf32> to vector<8x56xf32>
    %223 = vector.extract_strided_slice %218 {offsets = [0, 0], sizes = [2, 58], strides = [1, 1]} : vector<8x58xf32> to vector<2x58xf32>
    %224 = tpu.concatenate %223, %223, %223, %223 in 0 : vector<2x58xf32>, vector<2x58xf32>, vector<2x58xf32>, vector<2x58xf32> -> vector<8x58xf32>
    %225 = vector.extract_strided_slice %219 {offsets = [0, 0, 0], sizes = [1, 8, 1], strides = [1, 1, 1]} : vector<12x8x1xf32> to vector<1x8x1xf32>
    %226 = vector.shape_cast %225 : vector<1x8x1xf32> to vector<8x1xf32>
    %227 = vector.extract_strided_slice %224 {offsets = [0, 0], sizes = [8, 56], strides = [1, 1]} : vector<8x58xf32> to vector<8x56xf32>
    %228 = vector.broadcast %226 : vector<8x1xf32> to vector<8x56xf32>
    %229 = arith.mulf %228, %227 : vector<8x56xf32>
    %230 = arith.addf %222, %229 : vector<8x56xf32>
    %231 = vector.extract_strided_slice %219 {offsets = [1, 0, 0], sizes = [1, 8, 1], strides = [1, 1, 1]} : vector<12x8x1xf32> to vector<1x8x1xf32>
    %232 = vector.shape_cast %231 : vector<1x8x1xf32> to vector<8x1xf32>
    %233 = vector.extract_strided_slice %224 {offsets = [0, 1], sizes = [8, 56], strides = [1, 1]} : vector<8x58xf32> to vector<8x56xf32>
    %234 = vector.broadcast %232 : vector<8x1xf32> to vector<8x56xf32>
    %235 = arith.mulf %234, %233 : vector<8x56xf32>
    %236 = arith.addf %230, %235 : vector<8x56xf32>
    %237 = vector.extract_strided_slice %219 {offsets = [2, 0, 0], sizes = [1, 8, 1], strides = [1, 1, 1]} : vector<12x8x1xf32> to vector<1x8x1xf32>
    %238 = vector.shape_cast %237 : vector<1x8x1xf32> to vector<8x1xf32>
    %239 = vector.extract_strided_slice %224 {offsets = [0, 2], sizes = [8, 56], strides = [1, 1]} : vector<8x58xf32> to vector<8x56xf32>
    %240 = vector.broadcast %238 : vector<8x1xf32> to vector<8x56xf32>
    %241 = arith.mulf %240, %239 : vector<8x56xf32>
    %242 = arith.addf %236, %241 : vector<8x56xf32>
    %243 = vector.extract_strided_slice %218 {offsets = [2, 0], sizes = [2, 58], strides = [1, 1]} : vector<8x58xf32> to vector<2x58xf32>
    %244 = tpu.concatenate %243, %243, %243, %243 in 0 : vector<2x58xf32>, vector<2x58xf32>, vector<2x58xf32>, vector<2x58xf32> -> vector<8x58xf32>
    %245 = vector.extract_strided_slice %219 {offsets = [3, 0, 0], sizes = [1, 8, 1], strides = [1, 1, 1]} : vector<12x8x1xf32> to vector<1x8x1xf32>
    %246 = vector.shape_cast %245 : vector<1x8x1xf32> to vector<8x1xf32>
    %247 = vector.extract_strided_slice %244 {offsets = [0, 0], sizes = [8, 56], strides = [1, 1]} : vector<8x58xf32> to vector<8x56xf32>
    %248 = vector.broadcast %246 : vector<8x1xf32> to vector<8x56xf32>
    %249 = arith.mulf %248, %247 : vector<8x56xf32>
    %250 = arith.addf %242, %249 : vector<8x56xf32>
    %251 = vector.extract_strided_slice %219 {offsets = [4, 0, 0], sizes = [1, 8, 1], strides = [1, 1, 1]} : vector<12x8x1xf32> to vector<1x8x1xf32>
    %252 = vector.shape_cast %251 : vector<1x8x1xf32> to vector<8x1xf32>
    %253 = vector.extract_strided_slice %244 {offsets = [0, 1], sizes = [8, 56], strides = [1, 1]} : vector<8x58xf32> to vector<8x56xf32>
    %254 = vector.broadcast %252 : vector<8x1xf32> to vector<8x56xf32>
    %255 = arith.mulf %254, %253 : vector<8x56xf32>
    %256 = arith.addf %250, %255 : vector<8x56xf32>
    %257 = vector.extract_strided_slice %219 {offsets = [5, 0, 0], sizes = [1, 8, 1], strides = [1, 1, 1]} : vector<12x8x1xf32> to vector<1x8x1xf32>
    %258 = vector.shape_cast %257 : vector<1x8x1xf32> to vector<8x1xf32>
    %259 = vector.extract_strided_slice %244 {offsets = [0, 2], sizes = [8, 56], strides = [1, 1]} : vector<8x58xf32> to vector<8x56xf32>
    %260 = vector.broadcast %258 : vector<8x1xf32> to vector<8x56xf32>
    %261 = arith.mulf %260, %259 : vector<8x56xf32>
    %262 = arith.addf %256, %261 : vector<8x56xf32>
    %263 = vector.extract_strided_slice %218 {offsets = [4, 0], sizes = [2, 58], strides = [1, 1]} : vector<8x58xf32> to vector<2x58xf32>
    %264 = tpu.concatenate %263, %263, %263, %263 in 0 : vector<2x58xf32>, vector<2x58xf32>, vector<2x58xf32>, vector<2x58xf32> -> vector<8x58xf32>
    %265 = vector.extract_strided_slice %219 {offsets = [6, 0, 0], sizes = [1, 8, 1], strides = [1, 1, 1]} : vector<12x8x1xf32> to vector<1x8x1xf32>
    %266 = vector.shape_cast %265 : vector<1x8x1xf32> to vector<8x1xf32>
    %267 = vector.extract_strided_slice %264 {offsets = [0, 0], sizes = [8, 56], strides = [1, 1]} : vector<8x58xf32> to vector<8x56xf32>
    %268 = vector.broadcast %266 : vector<8x1xf32> to vector<8x56xf32>
    %269 = arith.mulf %268, %267 : vector<8x56xf32>
    %270 = arith.addf %262, %269 : vector<8x56xf32>
    %271 = vector.extract_strided_slice %219 {offsets = [7, 0, 0], sizes = [1, 8, 1], strides = [1, 1, 1]} : vector<12x8x1xf32> to vector<1x8x1xf32>
    %272 = vector.shape_cast %271 : vector<1x8x1xf32> to vector<8x1xf32>
    %273 = vector.extract_strided_slice %264 {offsets = [0, 1], sizes = [8, 56], strides = [1, 1]} : vector<8x58xf32> to vector<8x56xf32>
    %274 = vector.broadcast %272 : vector<8x1xf32> to vector<8x56xf32>
    %275 = arith.mulf %274, %273 : vector<8x56xf32>
    %276 = arith.addf %270, %275 : vector<8x56xf32>
    %277 = vector.extract_strided_slice %219 {offsets = [8, 0, 0], sizes = [1, 8, 1], strides = [1, 1, 1]} : vector<12x8x1xf32> to vector<1x8x1xf32>
    %278 = vector.shape_cast %277 : vector<1x8x1xf32> to vector<8x1xf32>
    %279 = vector.extract_strided_slice %264 {offsets = [0, 2], sizes = [8, 56], strides = [1, 1]} : vector<8x58xf32> to vector<8x56xf32>
    %280 = vector.broadcast %278 : vector<8x1xf32> to vector<8x56xf32>
    %281 = arith.mulf %280, %279 : vector<8x56xf32>
    %282 = arith.addf %276, %281 : vector<8x56xf32>
    %283 = vector.extract_strided_slice %218 {offsets = [6, 0], sizes = [2, 58], strides = [1, 1]} : vector<8x58xf32> to vector<2x58xf32>
    %284 = tpu.concatenate %283, %283, %283, %283 in 0 : vector<2x58xf32>, vector<2x58xf32>, vector<2x58xf32>, vector<2x58xf32> -> vector<8x58xf32>
    %285 = vector.extract_strided_slice %219 {offsets = [9, 0, 0], sizes = [1, 8, 1], strides = [1, 1, 1]} : vector<12x8x1xf32> to vector<1x8x1xf32>
    %286 = vector.shape_cast %285 : vector<1x8x1xf32> to vector<8x1xf32>
    %287 = vector.extract_strided_slice %284 {offsets = [0, 0], sizes = [8, 56], strides = [1, 1]} : vector<8x58xf32> to vector<8x56xf32>
    %288 = vector.broadcast %286 : vector<8x1xf32> to vector<8x56xf32>
    %289 = arith.mulf %288, %287 : vector<8x56xf32>
    %290 = arith.addf %282, %289 : vector<8x56xf32>
    %291 = vector.extract_strided_slice %219 {offsets = [10, 0, 0], sizes = [1, 8, 1], strides = [1, 1, 1]} : vector<12x8x1xf32> to vector<1x8x1xf32>
    %292 = vector.shape_cast %291 : vector<1x8x1xf32> to vector<8x1xf32>
    %293 = vector.extract_strided_slice %284 {offsets = [0, 1], sizes = [8, 56], strides = [1, 1]} : vector<8x58xf32> to vector<8x56xf32>
    %294 = vector.broadcast %292 : vector<8x1xf32> to vector<8x56xf32>
    %295 = arith.mulf %294, %293 : vector<8x56xf32>
    %296 = arith.addf %290, %295 : vector<8x56xf32>
    %297 = vector.extract_strided_slice %219 {offsets = [11, 0, 0], sizes = [1, 8, 1], strides = [1, 1, 1]} : vector<12x8x1xf32> to vector<1x8x1xf32>
    %298 = vector.shape_cast %297 : vector<1x8x1xf32> to vector<8x1xf32>
    %299 = vector.extract_strided_slice %284 {offsets = [0, 2], sizes = [8, 56], strides = [1, 1]} : vector<8x58xf32> to vector<8x56xf32>
    %300 = vector.broadcast %298 : vector<8x1xf32> to vector<8x56xf32>
    %301 = arith.mulf %300, %299 : vector<8x56xf32>
    %302 = arith.addf %296, %301 : vector<8x56xf32>
    %cst_23 = arith.constant 0.000000e+00 : f32
    %303 = vector.broadcast %cst_23 : f32 to vector<8x56xf32>
    %304 = arith.maximumf %302, %303 : vector<8x56xf32>
    %c0_24 = arith.constant 0 : index
    %c0_25 = arith.constant 0 : index
    %c0_26 = arith.constant 0 : index
    %305 = vector.load %arg9[%c0_24, %c0_25, %c0_26] : memref<12x8x1xf32, #tpu.memory_space<vmem>>, vector<12x8x1xf32>
    %c0_27 = arith.constant 0 : index
    %c0_28 = arith.constant 0 : index
    %306 = vector.load %arg10[%c0_27, %c0_28] : memref<8x1xf32, #tpu.memory_space<vmem>>, vector<8x1xf32>
    %307 = vector.shape_cast %306 : vector<8x1xf32> to vector<8x1xf32>
    %308 = vector.broadcast %307 : vector<8x1xf32> to vector<8x54xf32>
    %309 = vector.extract_strided_slice %304 {offsets = [0, 0], sizes = [2, 56], strides = [1, 1]} : vector<8x56xf32> to vector<2x56xf32>
    %310 = tpu.concatenate %309, %309, %309, %309 in 0 : vector<2x56xf32>, vector<2x56xf32>, vector<2x56xf32>, vector<2x56xf32> -> vector<8x56xf32>
    %311 = vector.extract_strided_slice %305 {offsets = [0, 0, 0], sizes = [1, 8, 1], strides = [1, 1, 1]} : vector<12x8x1xf32> to vector<1x8x1xf32>
    %312 = vector.shape_cast %311 : vector<1x8x1xf32> to vector<8x1xf32>
    %313 = vector.extract_strided_slice %310 {offsets = [0, 0], sizes = [8, 54], strides = [1, 1]} : vector<8x56xf32> to vector<8x54xf32>
    %314 = vector.broadcast %312 : vector<8x1xf32> to vector<8x54xf32>
    %315 = arith.mulf %314, %313 : vector<8x54xf32>
    %316 = arith.addf %308, %315 : vector<8x54xf32>
    %317 = vector.extract_strided_slice %305 {offsets = [1, 0, 0], sizes = [1, 8, 1], strides = [1, 1, 1]} : vector<12x8x1xf32> to vector<1x8x1xf32>
    %318 = vector.shape_cast %317 : vector<1x8x1xf32> to vector<8x1xf32>
    %319 = vector.extract_strided_slice %310 {offsets = [0, 1], sizes = [8, 54], strides = [1, 1]} : vector<8x56xf32> to vector<8x54xf32>
    %320 = vector.broadcast %318 : vector<8x1xf32> to vector<8x54xf32>
    %321 = arith.mulf %320, %319 : vector<8x54xf32>
    %322 = arith.addf %316, %321 : vector<8x54xf32>
    %323 = vector.extract_strided_slice %305 {offsets = [2, 0, 0], sizes = [1, 8, 1], strides = [1, 1, 1]} : vector<12x8x1xf32> to vector<1x8x1xf32>
    %324 = vector.shape_cast %323 : vector<1x8x1xf32> to vector<8x1xf32>
    %325 = vector.extract_strided_slice %310 {offsets = [0, 2], sizes = [8, 54], strides = [1, 1]} : vector<8x56xf32> to vector<8x54xf32>
    %326 = vector.broadcast %324 : vector<8x1xf32> to vector<8x54xf32>
    %327 = arith.mulf %326, %325 : vector<8x54xf32>
    %328 = arith.addf %322, %327 : vector<8x54xf32>
    %329 = vector.extract_strided_slice %304 {offsets = [2, 0], sizes = [2, 56], strides = [1, 1]} : vector<8x56xf32> to vector<2x56xf32>
    %330 = tpu.concatenate %329, %329, %329, %329 in 0 : vector<2x56xf32>, vector<2x56xf32>, vector<2x56xf32>, vector<2x56xf32> -> vector<8x56xf32>
    %331 = vector.extract_strided_slice %305 {offsets = [3, 0, 0], sizes = [1, 8, 1], strides = [1, 1, 1]} : vector<12x8x1xf32> to vector<1x8x1xf32>
    %332 = vector.shape_cast %331 : vector<1x8x1xf32> to vector<8x1xf32>
    %333 = vector.extract_strided_slice %330 {offsets = [0, 0], sizes = [8, 54], strides = [1, 1]} : vector<8x56xf32> to vector<8x54xf32>
    %334 = vector.broadcast %332 : vector<8x1xf32> to vector<8x54xf32>
    %335 = arith.mulf %334, %333 : vector<8x54xf32>
    %336 = arith.addf %328, %335 : vector<8x54xf32>
    %337 = vector.extract_strided_slice %305 {offsets = [4, 0, 0], sizes = [1, 8, 1], strides = [1, 1, 1]} : vector<12x8x1xf32> to vector<1x8x1xf32>
    %338 = vector.shape_cast %337 : vector<1x8x1xf32> to vector<8x1xf32>
    %339 = vector.extract_strided_slice %330 {offsets = [0, 1], sizes = [8, 54], strides = [1, 1]} : vector<8x56xf32> to vector<8x54xf32>
    %340 = vector.broadcast %338 : vector<8x1xf32> to vector<8x54xf32>
    %341 = arith.mulf %340, %339 : vector<8x54xf32>
    %342 = arith.addf %336, %341 : vector<8x54xf32>
    %343 = vector.extract_strided_slice %305 {offsets = [5, 0, 0], sizes = [1, 8, 1], strides = [1, 1, 1]} : vector<12x8x1xf32> to vector<1x8x1xf32>
    %344 = vector.shape_cast %343 : vector<1x8x1xf32> to vector<8x1xf32>
    %345 = vector.extract_strided_slice %330 {offsets = [0, 2], sizes = [8, 54], strides = [1, 1]} : vector<8x56xf32> to vector<8x54xf32>
    %346 = vector.broadcast %344 : vector<8x1xf32> to vector<8x54xf32>
    %347 = arith.mulf %346, %345 : vector<8x54xf32>
    %348 = arith.addf %342, %347 : vector<8x54xf32>
    %349 = vector.extract_strided_slice %304 {offsets = [4, 0], sizes = [2, 56], strides = [1, 1]} : vector<8x56xf32> to vector<2x56xf32>
    %350 = tpu.concatenate %349, %349, %349, %349 in 0 : vector<2x56xf32>, vector<2x56xf32>, vector<2x56xf32>, vector<2x56xf32> -> vector<8x56xf32>
    %351 = vector.extract_strided_slice %305 {offsets = [6, 0, 0], sizes = [1, 8, 1], strides = [1, 1, 1]} : vector<12x8x1xf32> to vector<1x8x1xf32>
    %352 = vector.shape_cast %351 : vector<1x8x1xf32> to vector<8x1xf32>
    %353 = vector.extract_strided_slice %350 {offsets = [0, 0], sizes = [8, 54], strides = [1, 1]} : vector<8x56xf32> to vector<8x54xf32>
    %354 = vector.broadcast %352 : vector<8x1xf32> to vector<8x54xf32>
    %355 = arith.mulf %354, %353 : vector<8x54xf32>
    %356 = arith.addf %348, %355 : vector<8x54xf32>
    %357 = vector.extract_strided_slice %305 {offsets = [7, 0, 0], sizes = [1, 8, 1], strides = [1, 1, 1]} : vector<12x8x1xf32> to vector<1x8x1xf32>
    %358 = vector.shape_cast %357 : vector<1x8x1xf32> to vector<8x1xf32>
    %359 = vector.extract_strided_slice %350 {offsets = [0, 1], sizes = [8, 54], strides = [1, 1]} : vector<8x56xf32> to vector<8x54xf32>
    %360 = vector.broadcast %358 : vector<8x1xf32> to vector<8x54xf32>
    %361 = arith.mulf %360, %359 : vector<8x54xf32>
    %362 = arith.addf %356, %361 : vector<8x54xf32>
    %363 = vector.extract_strided_slice %305 {offsets = [8, 0, 0], sizes = [1, 8, 1], strides = [1, 1, 1]} : vector<12x8x1xf32> to vector<1x8x1xf32>
    %364 = vector.shape_cast %363 : vector<1x8x1xf32> to vector<8x1xf32>
    %365 = vector.extract_strided_slice %350 {offsets = [0, 2], sizes = [8, 54], strides = [1, 1]} : vector<8x56xf32> to vector<8x54xf32>
    %366 = vector.broadcast %364 : vector<8x1xf32> to vector<8x54xf32>
    %367 = arith.mulf %366, %365 : vector<8x54xf32>
    %368 = arith.addf %362, %367 : vector<8x54xf32>
    %369 = vector.extract_strided_slice %304 {offsets = [6, 0], sizes = [2, 56], strides = [1, 1]} : vector<8x56xf32> to vector<2x56xf32>
    %370 = tpu.concatenate %369, %369, %369, %369 in 0 : vector<2x56xf32>, vector<2x56xf32>, vector<2x56xf32>, vector<2x56xf32> -> vector<8x56xf32>
    %371 = vector.extract_strided_slice %305 {offsets = [9, 0, 0], sizes = [1, 8, 1], strides = [1, 1, 1]} : vector<12x8x1xf32> to vector<1x8x1xf32>
    %372 = vector.shape_cast %371 : vector<1x8x1xf32> to vector<8x1xf32>
    %373 = vector.extract_strided_slice %370 {offsets = [0, 0], sizes = [8, 54], strides = [1, 1]} : vector<8x56xf32> to vector<8x54xf32>
    %374 = vector.broadcast %372 : vector<8x1xf32> to vector<8x54xf32>
    %375 = arith.mulf %374, %373 : vector<8x54xf32>
    %376 = arith.addf %368, %375 : vector<8x54xf32>
    %377 = vector.extract_strided_slice %305 {offsets = [10, 0, 0], sizes = [1, 8, 1], strides = [1, 1, 1]} : vector<12x8x1xf32> to vector<1x8x1xf32>
    %378 = vector.shape_cast %377 : vector<1x8x1xf32> to vector<8x1xf32>
    %379 = vector.extract_strided_slice %370 {offsets = [0, 1], sizes = [8, 54], strides = [1, 1]} : vector<8x56xf32> to vector<8x54xf32>
    %380 = vector.broadcast %378 : vector<8x1xf32> to vector<8x54xf32>
    %381 = arith.mulf %380, %379 : vector<8x54xf32>
    %382 = arith.addf %376, %381 : vector<8x54xf32>
    %383 = vector.extract_strided_slice %305 {offsets = [11, 0, 0], sizes = [1, 8, 1], strides = [1, 1, 1]} : vector<12x8x1xf32> to vector<1x8x1xf32>
    %384 = vector.shape_cast %383 : vector<1x8x1xf32> to vector<8x1xf32>
    %385 = vector.extract_strided_slice %370 {offsets = [0, 2], sizes = [8, 54], strides = [1, 1]} : vector<8x56xf32> to vector<8x54xf32>
    %386 = vector.broadcast %384 : vector<8x1xf32> to vector<8x54xf32>
    %387 = arith.mulf %386, %385 : vector<8x54xf32>
    %388 = arith.addf %382, %387 : vector<8x54xf32>
    %cst_29 = arith.constant 0.000000e+00 : f32
    %389 = vector.broadcast %cst_29 : f32 to vector<8x54xf32>
    %390 = arith.maximumf %388, %389 : vector<8x54xf32>
    %c0_30 = arith.constant 0 : index
    %c0_31 = arith.constant 0 : index
    %391 = vector.load %arg12[%c0_30, %c0_31] : memref<1x6xf32, #tpu.memory_space<vmem>>, vector<1x6xf32>
    %392 = vector.shape_cast %391 : vector<1x6xf32> to vector<1x6xf32>
    %393 = vector.broadcast %392 : vector<1x6xf32> to vector<2x6xf32>
    %394 = vector.extract_strided_slice %390 {offsets = [0, 0], sizes = [2, 54], strides = [1, 1]} : vector<8x54xf32> to vector<2x54xf32>
    %c0_32 = arith.constant 0 : index
    %c0_33 = arith.constant 0 : index
    %c0_34 = arith.constant 0 : index
    %395 = vector.load %arg11[%c0_32, %c0_33, %c0_34] : memref<4x54x6xf32, #tpu.memory_space<vmem>>, vector<1x54x6xf32>
    %396 = vector.shape_cast %395 : vector<1x54x6xf32> to vector<54x6xf32>
    %cst_35 = arith.constant dense<0.000000e+00> : vector<2x6xf32>
    %397 = tpu.matmul %394, %396, %cst_35 {dimension_numbers = #tpu.dot_dimension_numbers<[1], [0], [0], [1], [0, 0, 1, 1], [], []>} : vector<2x54xf32>, vector<54x6xf32>, vector<2x6xf32> -> vector<2x6xf32>
    %398 = arith.addf %393, %397 : vector<2x6xf32>
    %399 = vector.extract_strided_slice %390 {offsets = [2, 0], sizes = [2, 54], strides = [1, 1]} : vector<8x54xf32> to vector<2x54xf32>
    %c1 = arith.constant 1 : index
    %c0_36 = arith.constant 0 : index
    %c0_37 = arith.constant 0 : index
    %400 = vector.load %arg11[%c1, %c0_36, %c0_37] : memref<4x54x6xf32, #tpu.memory_space<vmem>>, vector<1x54x6xf32>
    %401 = vector.shape_cast %400 : vector<1x54x6xf32> to vector<54x6xf32>
    %cst_38 = arith.constant dense<0.000000e+00> : vector<2x6xf32>
    %402 = tpu.matmul %399, %401, %cst_38 {dimension_numbers = #tpu.dot_dimension_numbers<[1], [0], [0], [1], [0, 0, 1, 1], [], []>} : vector<2x54xf32>, vector<54x6xf32>, vector<2x6xf32> -> vector<2x6xf32>
    %403 = arith.addf %398, %402 : vector<2x6xf32>
    %404 = vector.extract_strided_slice %390 {offsets = [4, 0], sizes = [2, 54], strides = [1, 1]} : vector<8x54xf32> to vector<2x54xf32>
    %c2 = arith.constant 2 : index
    %c0_39 = arith.constant 0 : index
    %c0_40 = arith.constant 0 : index
    %405 = vector.load %arg11[%c2, %c0_39, %c0_40] : memref<4x54x6xf32, #tpu.memory_space<vmem>>, vector<1x54x6xf32>
    %406 = vector.shape_cast %405 : vector<1x54x6xf32> to vector<54x6xf32>
    %cst_41 = arith.constant dense<0.000000e+00> : vector<2x6xf32>
    %407 = tpu.matmul %404, %406, %cst_41 {dimension_numbers = #tpu.dot_dimension_numbers<[1], [0], [0], [1], [0, 0, 1, 1], [], []>} : vector<2x54xf32>, vector<54x6xf32>, vector<2x6xf32> -> vector<2x6xf32>
    %408 = arith.addf %403, %407 : vector<2x6xf32>
    %409 = vector.extract_strided_slice %390 {offsets = [6, 0], sizes = [2, 54], strides = [1, 1]} : vector<8x54xf32> to vector<2x54xf32>
    %c3 = arith.constant 3 : index
    %c0_42 = arith.constant 0 : index
    %c0_43 = arith.constant 0 : index
    %410 = vector.load %arg11[%c3, %c0_42, %c0_43] : memref<4x54x6xf32, #tpu.memory_space<vmem>>, vector<1x54x6xf32>
    %411 = vector.shape_cast %410 : vector<1x54x6xf32> to vector<54x6xf32>
    %cst_44 = arith.constant dense<0.000000e+00> : vector<2x6xf32>
    %412 = tpu.matmul %409, %411, %cst_44 {dimension_numbers = #tpu.dot_dimension_numbers<[1], [0], [0], [1], [0, 0, 1, 1], [], []>} : vector<2x54xf32>, vector<54x6xf32>, vector<2x6xf32> -> vector<2x6xf32>
    %413 = arith.addf %408, %412 : vector<2x6xf32>
    %cst_45 = arith.constant dense<0xFF800000> : vector<2xf32>
    %414 = vector.multi_reduction <maximumf>, %413, %cst_45 [1] : vector<2x6xf32> to vector<2xf32>
    %415 = vector.shape_cast %414 : vector<2xf32> to vector<2x1xf32>
    %416 = vector.broadcast %415 : vector<2x1xf32> to vector<2x6xf32>
    %417 = arith.subf %413, %416 : vector<2x6xf32>
    %418 = math.exp %417 : vector<2x6xf32>
    %cst_46 = arith.constant dense<0.000000e+00> : vector<2xf32>
    %419 = vector.multi_reduction <add>, %418, %cst_46 [1] : vector<2x6xf32> to vector<2xf32>
    %420 = vector.shape_cast %419 : vector<2xf32> to vector<2x1xf32>
    %421 = vector.broadcast %420 : vector<2x1xf32> to vector<2x6xf32>
    %422 = arith.divf %418, %421 : vector<2x6xf32>
    %c0_47 = arith.constant 0 : index
    %c0_48 = arith.constant 0 : index
    %423 = vector.load %arg13[%c0_47, %c0_48] : memref<2x6xf32, #tpu.memory_space<vmem>>, vector<2x6xf32>
    tpu.vector_store %arg13[%c0_47, %c0_48], %422 {strides = array<i32>} : memref<2x6xf32, #tpu.memory_space<vmem>>, vector<2x6xf32>,
    return
  }
}

</mosaic_0001>

<bundles_post_ra>
// kernel: tpu_custom_call.1
= control target key start
LH: loop header
LB: loop body
LE: loop exit
PB: predicated region body
PF: predicated region fallthrough
CT: control target
= control target key end

     0   :  { %v1002_v3 = vmov 0   ;;  %s1458_s0 = inlined_call_operand.vmem [shape: f32[4,64], index: 0, kind: input, shape index: {}]   ;;  %s1459_s1 = inlined_call_operand.vmem [shape: f32[6,8,1], index: 1, kind: input, shape index: {}]   ;;  %s1460_s2 = inlined_call_operand.vmem [shape: f32[8,1], index: 2, kind: input, shape index: {}]   ;;  %s1461_s3 = inlined_call_operand.vmem [shape: f32[12,8,1], index: 3, kind: input, shape index: {}]   ;;  %s1462_s4 = inlined_call_operand.vmem [shape: f32[8,1], index: 4, kind: input, shape index: {}]   ;;  %s1463_s5 = inlined_call_operand.vmem [shape: f32[12,8,1], index: 5, kind: input, shape index: {}]   ;;  %s1464_s6 = inlined_call_operand.vmem [shape: f32[8,1], index: 6, kind: input, shape index: {}]   ;;  %s1465_s7 = inlined_call_operand.vmem [shape: f32[12,8,1], index: 7, kind: input, shape index: {}]   ;;  %s1466_s8 = inlined_call_operand.vmem [shape: f32[8,1], index: 8, kind: input, shape index: {}]   ;;  %s1467_s9 = inlined_call_operand.vmem [shape: f32[12,8,1], index: 9, kind: input, shape index: {}]   ;;  %s1468_s10 = inlined_call_operand.vmem [shape: f32[8,1], index: 10, kind: input, shape index: {}]   ;;  %s1469_s11 = inlined_call_operand.vmem [shape: f32[4,54,6], index: 11, kind: input, shape index: {}]   ;;  %s1470_s12 = inlined_call_operand.vmem [shape: f32[1,6], index: 12, kind: input, shape index: {}]   ;;  %s1471_s13 = inlined_call_operand.hbm [shape: f32[2,6], index: 13, kind: output, shape index: {}]  }
   0x1   :  { %v50_v0 = vld [vmem:[%s1459_s1 + $0x20] sm:$0xff]  ;;  %v47_v1 = vld [vmem:[%s1459_s1 + $0x8] sm:$0xff]  ;;  %970 = vset.pattern.permute.xlu2 %v1002_v3  ;;  %969 = vset.pattern.permute.xlu1 %v1002_v3 }
   0x2   :  { %v46_v2 = vld [vmem:[%s1459_s1] sm:$0xff]  ;;  %968 = vset.pattern.permute.xlu0 %v1002_v3  ;;  %112 = vperm.xlu1 %969, %v50_v0  }
   0x3   :  { %80 = vperm.xlu0 %968, %v47_v1   ;;  %73 = vperm.xlu2 %970, %v46_v2  }
   0x4   :  { %18 = vsyncpa [#allocation3], 0  ;;  %v51_v4 = vld [vmem:[%s1459_s1 + $0x28] sm:$0xff]  ;;  %v48_v5 = vld [vmem:[%s1459_s1 + $0x10] sm:$0xff]  ;;  %vm65_vm0 = vcmask 1041408   ;;  %vm67_vm1 = vcmask 1043456  }
   0x5   :  { %v52_v6 = vld [vmem:[%s1460_s2] sm:$0xff]  ;;  %v49_v7 = vld [vmem:[%s1459_s1 + $0x18] sm:$0xff]  ;;  %v134_v8 = vld [vmem:[%s1461_s3 + $0x8] sm:$0xff]  ;;  %vm69_vm2 = vcmask 1045504   ;;  %s1004_s28 = smov 126   ;;  %vm760_vm3 = vcmask 441344  }
   0x6   :  { %v138_v9 = vld [vmem:[%s1461_s3 + $0x28] sm:$0xff]  ;;  %v143_v10 = vld [vmem:[%s1461_s3 + $0x50] sm:$0xff]  ;;  %v145_v11 = vld [vmem:[%s1462_s4] sm:$0xff]  ;;  %vm893_vm4 = vcmask 41984   ;;  %s926_s20 = sshll.u32 %s1471_s13, 4  ;;  %s927_s20 = int_to_ptr.hbm [resolvable:$true] %s926_s20 }
   0x7   :  { %v136_v12 = vld [vmem:[%s1461_s3 + $0x18] sm:$0xff]  ;;  %v139_v13 = vld [vmem:[%s1461_s3 + $0x30] sm:$0xff]  ;;  %v142_v14 = vld [vmem:[%s1461_s3 + $0x48] sm:$0xff] }
   0x8   :  { %v288_v15 = vld [vmem:[%s1463_s5 + $0x8] sm:$0xff]  ;;  %v297_v17 = vld [vmem:[%s1463_s5 + $0x50] sm:$0xff]  ;;  %v45_v18 = vld [vmem:[%s1458_s0] sm:$0xf]  ;;  %s1003_s0 = smov 127  }
   0x9   :  { %v292_v16 = vld [vmem:[%s1463_s5 + $0x28] sm:$0xff]  ;;  %v299_v19 = vld [vmem:[%s1464_s6] sm:$0xff]  ;;  %v59_v20 = vrot.slane %v45_v18, 6  ;;  %v61_v21 = vrot.slane %v45_v18, 4  ;;  %v63_v23 = vrot.slane %v45_v18, 2  ;;  %v290_v25 = vld [vmem:[%s1463_s5 + $0x18] sm:$0xff] }
   0xa   :  { %123 = vperm.xlu1 %969, %v51_v4   ;;  %v293_v31 = vld [vmem:[%s1463_s5 + $0x30] sm:$0xff]  ;;  %v296_v37 = vld [vmem:[%s1463_s5 + $0x48] sm:$0xff]  ;;  %v137_v42 = vld [vmem:[%s1461_s3 + $0x20] sm:$0xff] }
   0xb   :  { %91 = vperm.xlu0 %968, %v48_v5   ;;  %55 = vperm.xlu2 %970, %v52_v6   ;;  %v66_v22 = vsel %vm65_vm0, %v45_v18, %v59_v20  ;;  %v100_v27 = vsel %vm65_vm0, %v63_v23, %v45_v18  ;;  %v135_v39 = vld [vmem:[%s1461_s3 + $0x10] sm:$0xff]  ;;  %v442_v41 = vld [vmem:[%s1465_s7 + $0x8] sm:$0xff]  ;;  %v140_v43 = vld [vmem:[%s1461_s3 + $0x38] sm:$0xff] }
   0xc   :  { %v68_v24 = vsel %vm67_vm1, %v66_v22, %v61_v21  ;;  %v101_v29 = vsel %vm67_vm1, %v100_v27, %v59_v20  ;;  %v446_v44 = vld [vmem:[%s1465_s7 + $0x28] sm:$0xff]  ;;  %v141_v45 = vld [vmem:[%s1461_s3 + $0x40] sm:$0xff]  ;;  %v144_v46 = vld [vmem:[%s1461_s3 + $0x58] sm:$0xff] }
   0xd   :  { %v70_v26 = vsel %vm69_vm2, %v68_v24, %v63_v23  ;;  %v102_v32 = vsel %vm69_vm2, %v101_v29, %v61_v21  ;;  %v451_v47 = vld [vmem:[%s1465_s7 + $0x50] sm:$0xff]  ;;  %v133_v48 = vld [vmem:[%s1461_s3] sm:$0xff]  ;;  %v444_v50 = vld [vmem:[%s1465_s7 + $0x18] sm:$0xff] }
   0xe   :  { %v453_v49 = vld [vmem:[%s1466_s8] sm:$0xff]  ;;  %v447_v51 = vld [vmem:[%s1465_s7 + $0x30] sm:$0xff]  ;;  %v450_v52 = vld [vmem:[%s1465_s7 + $0x48] sm:$0xff] }
   0xf   :  { %v596_v53 = vld [vmem:[%s1467_s9 + $0x8] sm:$0xff]  ;;  %v605_v55 = vld [vmem:[%s1467_s9 + $0x50] sm:$0xff]  ;;  %v607_v56 = vld [vmem:[%s1468_s10] sm:$0xff] }
  0x10   :  { %v600_v54 = vld [vmem:[%s1467_s9 + $0x28] sm:$0xff]  ;;  %v598_v58 = vld [vmem:[%s1467_s9 + $0x18] sm:$0xff]  ;;  %v601_v60 = vld [vmem:[%s1467_s9 + $0x30] sm:$0xff] }
  0x11   :  { %v604_v0 = vld [vmem:[%s1467_s9 + $0x48] sm:$0xff] }
  0x13   :  { %105 = vperm.xlu2 %970, %v49_v7  }
  0x1b   :  { %170 = vperm.xlu2 %970, %v134_v8  }
  0x23   :  { %213 = vperm.xlu2 %970, %v138_v9  }
  0x2b   :  { %266 = vperm.xlu2 %970, %v143_v10  }
  0x33   :  { %148 = vperm.xlu2 %970, %v145_v11  }
  0x3b   :  { %195 = vperm.xlu2 %970, %v136_v12  }
  0x43   :  { %227 = vperm.xlu2 %970, %v139_v13  }
  0x4b   :  { %259 = vperm.xlu2 %970, %v142_v14  }
  0x53   :  { %324 = vperm.xlu2 %970, %v288_v15  }
  0x5b   :  { %367 = vperm.xlu2 %970, %v292_v16  }
  0x5d   :  { %v74_v57 = vpop.permute.xlu2 %73 }
  0x5e   :  { %v76_v61 = vmul.f32 %v74_v57, %v70_v26 }
  0x63   :  { %420 = vperm.xlu2 %970, %v297_v17  }
  0x65   :  { %v56_v59 = vpop.permute.xlu2 %55 }
  0x66   :  { %v77_v63 = vadd.f32 %v76_v61, %v56_v59 }
  0x6b   :  { %302 = vperm.xlu2 %970, %v299_v19  }
  0x6d   :  { %v106_v2 = vpop.permute.xlu2 %105 }
  0x6e   :  { %v108_v4 = vmul.f32 %v106_v2, %v102_v32 }
  0x73   :  { %349 = vperm.xlu2 %970, %v290_v25  }
  0x74   :  { %v113_v33 = vpop.permute.xlu1 %112 }
  0x75   :  { %v81_v28 = vpop.permute.xlu0 %80  ;;  %v115_v34 = vmul.f32 %v113_v33, %v102_v32  ;;  %v171_v15 = vpop.permute.xlu2 %170 }
  0x76   :  { %v83_v30 = vmul.f32 %v81_v28, %v70_v26 }
  0x78   :  { %85 = vrot.lane.b32.xlu0 %v83_v30, %s1003_s0 }
  0x7b   :  { %381 = vperm.xlu2 %970, %v293_v31  }
  0x7c   :  { %v124_v38 = vpop.permute.xlu1 %123 }
  0x7d   :  { %v92_v35 = vpop.permute.xlu0 %91  ;;  %v126_v40 = vmul.f32 %v124_v38, %v102_v32 }
  0x7e   :  { %v94_v36 = vmul.f32 %v92_v35, %v70_v26  ;;  %v214_v26 = vpop.permute.xlu2 %213 }
  0x80   :  { %96 = vrot.lane.b32.xlu1 %v94_v36, %s1004_s28  ;;  %117 = vrot.lane.b32.xlu0 %v115_v34, %s1003_s0 }
  0x83   :  { %413 = vperm.xlu2 %970, %v296_v37  }
  0x88   :  { %128 = vrot.lane.b32.xlu1 %v126_v40, %s1004_s28  ;;  %181 = vperm.xlu0 %968, %v135_v39   ;;  %v267_v40 = vpop.permute.xlu2 %266 }
  0x8b   :  { %478 = vperm.xlu2 %970, %v442_v41  }
  0x90   :  { %202 = vperm.xlu1 %969, %v137_v42   ;;  %234 = vperm.xlu0 %968, %v140_v43   ;;  %v291_v43 = vld [vmem:[%s1463_s5 + $0x20] sm:$0xff] }
  0x93   :  { %521 = vperm.xlu2 %970, %v446_v44   ;;  %v289_v44 = vld [vmem:[%s1463_s5 + $0x10] sm:$0xff] }
  0x98   :  { %245 = vperm.xlu1 %969, %v141_v45   ;;  %277 = vperm.xlu0 %968, %v144_v46   ;;  %v295_v45 = vld [vmem:[%s1463_s5 + $0x40] sm:$0xff]  ;;  %v294_v46 = vld [vmem:[%s1463_s5 + $0x38] sm:$0xff] }
  0x9b   :  { %574 = vperm.xlu2 %970, %v451_v47   ;;  %v287_v47 = vld [vmem:[%s1463_s5] sm:$0xff] }
  0xa0   :  { %163 = vperm.xlu1 %969, %v133_v48   ;;  %v298_v48 = vld [vmem:[%s1463_s5 + $0x58] sm:$0xff] }
  0xa3   :  { %456 = vperm.xlu2 %970, %v453_v49   ;;  %v149_v49 = vpop.permute.xlu2 %148 }
  0xab   :  { %503 = vperm.xlu2 %970, %v444_v50  }
  0xb3   :  { %535 = vperm.xlu2 %970, %v447_v51  }
  0xbb   :  { %567 = vperm.xlu2 %970, %v450_v52   ;;  %v196_v52 = vpop.permute.xlu2 %195 }
  0xc3   :  { %632 = vperm.xlu2 %970, %v596_v53  }
  0xcb   :  { %675 = vperm.xlu2 %970, %v600_v54  }
  0xd3   :  { %728 = vperm.xlu2 %970, %v605_v55  }
  0xdb   :  { %610 = vperm.xlu2 %970, %v607_v56  }
  0xe3   :  { %657 = vperm.xlu2 %970, %v598_v58  }
  0xea   :  { %v86_v62 = vpop.permute.xlu0 %85 }
  0xeb   :  { %689 = vperm.xlu2 %970, %v601_v60   ;;  %v88_v1 = vadd.f32 %v86_v62, %v77_v63  ;;  %v228_v60 = vpop.permute.xlu2 %227 }
  0xf2   :  { %v97_v3 = vpop.permute.xlu1 %96  ;;  %v118_v7 = vpop.permute.xlu0 %117 }
  0xf3   :  { %v99_v5 = vadd.f32 %v97_v3, %v88_v1  ;;  %721 = vperm.xlu2 %970, %v604_v0  }
  0xf5   :  { %v109_v6 = vadd.f32 %v108_v4, %v99_v5 }
  0xf7   :  { %v120_v8 = vadd.f32 %v118_v7, %v109_v6  ;;  %v260_v6 = vpop.permute.xlu2 %259 }
  0xfa   :  { %v129_v9 = vpop.permute.xlu1 %128  ;;  %v182_v18 = vpop.permute.xlu0 %181 }
  0xfb   :  { %v131_v10 = vadd.f32 %v129_v9, %v120_v8 }
  0xfd   :  { %v132_v11 = vmax.f32 %v131_v10, 0.0 }
  0xff   :  { %v152_v12 = vrot.slane %v132_v11, 6  ;;  %v154_v13 = vrot.slane %v132_v11, 4  ;;  %v156_v14 = vrot.slane %v132_v11, 2 }
 0x101   :  { %v158_v16 = vsel %vm65_vm0, %v132_v11, %v152_v12  ;;  %v190_v20 = vsel %vm65_vm0, %v156_v14, %v132_v11  ;;  %v222_v27 = vsel %vm65_vm0, %v154_v13, %v156_v14  ;;  %v254_v34 = vsel %vm65_vm0, %v152_v12, %v154_v13 }
 0x102   :  { %v159_v17 = vsel %vm67_vm1, %v158_v16, %v154_v13  ;;  %v191_v23 = vsel %vm67_vm1, %v190_v20, %v152_v12  ;;  %v203_v24 = vpop.permute.xlu1 %202  ;;  %v223_v30 = vsel %vm67_vm1, %v222_v27, %v132_v11  ;;  %v235_v31 = vpop.permute.xlu0 %234  ;;  %v255_v37 = vsel %vm67_vm1, %v254_v34, %v156_v14 }
 0x103   :  { %v160_v19 = vsel %vm69_vm2, %v159_v17, %v156_v14  ;;  %v192_v25 = vsel %vm69_vm2, %v191_v23, %v154_v13  ;;  %v224_v32 = vsel %vm69_vm2, %v223_v30, %v152_v12  ;;  %v256_v39 = vsel %vm69_vm2, %v255_v37, %v132_v11 }
 0x104   :  { %v184_v21 = vmul.f32 %v182_v18, %v160_v19  ;;  %v173_v22 = vmul.f32 %v171_v15, %v160_v19  ;;  %v205_v28 = vmul.f32 %v203_v24, %v192_v25  ;;  %v216_v29 = vmul.f32 %v214_v26, %v192_v25  ;;  %v325_v18 = vpop.permute.xlu2 %324 }
 0x105   :  { %v237_v35 = vmul.f32 %v235_v31, %v224_v32  ;;  %v269_v42 = vmul.f32 %v267_v40, %v256_v39  ;;  %v198_v58 = vmul.f32 %v196_v52, %v192_v25  ;;  %v230_v1 = vmul.f32 %v228_v60, %v224_v32 }
 0x106   :  { %186 = vrot.lane.b32.xlu1 %v184_v21, %s1004_s28  ;;  %175 = vrot.lane.b32.xlu0 %v173_v22, %s1003_s0  ;;  %v262_v8 = vmul.f32 %v260_v6, %v256_v39 }
 0x10a   :  { %v246_v33 = vpop.permute.xlu1 %245  ;;  %v278_v38 = vpop.permute.xlu0 %277 }
 0x10b   :  { %v248_v36 = vmul.f32 %v246_v33, %v224_v32  ;;  %v280_v41 = vmul.f32 %v278_v38, %v256_v39 }
 0x10e   :  { %218 = vrot.lane.b32.xlu1 %v216_v29, %s1004_s28  ;;  %207 = vrot.lane.b32.xlu0 %v205_v28, %s1003_s0  ;;  %v368_v29 = vpop.permute.xlu2 %367 }
 0x112   :  { %v164_v50 = vpop.permute.xlu1 %163 }
 0x113   :  { %v166_v51 = vmul.f32 %v164_v50, %v160_v19  ;;  %v441_v50 = vld [vmem:[%s1465_s7] sm:$0xff] }
 0x115   :  { %v167_v53 = vadd.f32 %v166_v51, %v149_v49  ;;  %v448_v49 = vld [vmem:[%s1465_s7 + $0x38] sm:$0xff] }
 0x116   :  { %250 = vrot.lane.b32.xlu1 %v248_v36, %s1004_s28  ;;  %239 = vrot.lane.b32.xlu0 %v237_v35, %s1003_s0  ;;  %v452_v51 = vld [vmem:[%s1465_s7 + $0x58] sm:$0xff] }
 0x11e   :  { %282 = vrot.lane.b32.xlu1 %v280_v41, %s1004_s28  ;;  %271 = vrot.lane.b32.xlu0 %v269_v42, %s1003_s0 }
 0x126   :  { %356 = vperm.xlu1 %969, %v291_v43   ;;  %335 = vperm.xlu0 %968, %v289_v44   ;;  %v421_v43 = vpop.permute.xlu2 %420 }
 0x12e   :  { %399 = vperm.xlu1 %969, %v295_v45   ;;  %388 = vperm.xlu0 %968, %v294_v46   ;;  %v445_v46 = vld [vmem:[%s1465_s7 + $0x20] sm:$0xff]  ;;  %v303_v52 = vpop.permute.xlu2 %302 }
 0x136   :  { %317 = vperm.xlu1 %969, %v287_v47   ;;  %431 = vperm.xlu0 %968, %v298_v48   ;;  %v443_v47 = vld [vmem:[%s1465_s7 + $0x10] sm:$0xff]  ;;  %v449_v48 = vld [vmem:[%s1465_s7 + $0x40] sm:$0xff] }
 0x178   :  { %v187_v54 = vpop.permute.xlu1 %186  ;;  %v176_v55 = vpop.permute.xlu0 %175 }
 0x179   :  { %v178_v56 = vadd.f32 %v176_v55, %v167_v53  ;;  %v350_v55 = vpop.permute.xlu2 %349 }
 0x17b   :  { %v189_v57 = vadd.f32 %v187_v54, %v178_v56 }
 0x17d   :  { %v199_v59 = vadd.f32 %v198_v58, %v189_v57 }
 0x180   :  { %v219_v61 = vpop.permute.xlu1 %218  ;;  %v208_v62 = vpop.permute.xlu0 %207 }
 0x181   :  { %v210_v63 = vadd.f32 %v208_v62, %v199_v59 }
 0x183   :  { %v221_v0 = vadd.f32 %v219_v61, %v210_v63  ;;  %v382_v63 = vpop.permute.xlu2 %381 }
 0x185   :  { %v231_v2 = vadd.f32 %v230_v1, %v221_v0 }
 0x188   :  { %v251_v3 = vpop.permute.xlu1 %250  ;;  %v240_v4 = vpop.permute.xlu0 %239 }
 0x189   :  { %v242_v5 = vadd.f32 %v240_v4, %v231_v2 }
 0x18b   :  { %v253_v7 = vadd.f32 %v251_v3, %v242_v5 }
 0x18d   :  { %v263_v9 = vadd.f32 %v262_v8, %v253_v7 }
 0x190   :  { %v272_v10 = vpop.permute.xlu0 %271  ;;  %v283_v12 = vpop.permute.xlu1 %282 }
 0x191   :  { %v274_v11 = vadd.f32 %v272_v10, %v263_v9  ;;  %v414_v9 = vpop.permute.xlu2 %413 }
 0x193   :  { %v285_v13 = vadd.f32 %v283_v12, %v274_v11 }
 0x195   :  { %v286_v14 = vmax.f32 %v285_v13, 0.0 }
 0x197   :  { %v306_v15 = vrot.slane %v286_v14, 6  ;;  %v308_v16 = vrot.slane %v286_v14, 4  ;;  %v310_v17 = vrot.slane %v286_v14, 2 }
 0x198   :  { %v336_v22 = vpop.permute.xlu0 %335  ;;  %v357_v27 = vpop.permute.xlu1 %356 }
 0x199   :  { %v312_v19 = vsel %vm65_vm0, %v286_v14, %v306_v15  ;;  %v344_v21 = vsel %vm65_vm0, %v310_v17, %v286_v14  ;;  %v376_v32 = vsel %vm65_vm0, %v308_v16, %v310_v17  ;;  %v408_v37 = vsel %vm65_vm0, %v306_v15, %v308_v16 }
 0x19a   :  { %v313_v20 = vsel %vm67_vm1, %v312_v19, %v308_v16  ;;  %v345_v26 = vsel %vm67_vm1, %v344_v21, %v306_v15  ;;  %v377_v34 = vsel %vm67_vm1, %v376_v32, %v286_v14  ;;  %v409_v40 = vsel %vm67_vm1, %v408_v37, %v310_v17  ;;  %v479_v21 = vpop.permute.xlu2 %478 }
 0x19b   :  { %v314_v23 = vsel %vm69_vm2, %v313_v20, %v310_v17  ;;  %v346_v28 = vsel %vm69_vm2, %v345_v26, %v308_v16  ;;  %v378_v36 = vsel %vm69_vm2, %v377_v34, %v306_v15  ;;  %v410_v42 = vsel %vm69_vm2, %v409_v40, %v286_v14 }
 0x19c   :  { %v338_v24 = vmul.f32 %v336_v22, %v314_v23  ;;  %v327_v25 = vmul.f32 %v325_v18, %v314_v23  ;;  %v359_v30 = vmul.f32 %v357_v27, %v346_v28  ;;  %v370_v31 = vmul.f32 %v368_v29, %v346_v28 }
 0x19d   :  { %v423_v45 = vmul.f32 %v421_v43, %v410_v42  ;;  %v352_v61 = vmul.f32 %v350_v55, %v346_v28  ;;  %v384_v4 = vmul.f32 %v382_v63, %v378_v36  ;;  %v416_v11 = vmul.f32 %v414_v9, %v410_v42 }
 0x19e   :  { %340 = vrot.lane.b32.xlu1 %v338_v24, %s1004_s28  ;;  %329 = vrot.lane.b32.xlu0 %v327_v25, %s1003_s0 }
 0x1a0   :  { %v389_v33 = vpop.permute.xlu0 %388  ;;  %v400_v35 = vpop.permute.xlu1 %399 }
 0x1a1   :  { %v402_v38 = vmul.f32 %v400_v35, %v378_v36  ;;  %v391_v39 = vmul.f32 %v389_v33, %v378_v36 }
 0x1a2   :  { %v522_v32 = vpop.permute.xlu2 %521 }
 0x1a6   :  { %372 = vrot.lane.b32.xlu1 %v370_v31, %s1004_s28  ;;  %361 = vrot.lane.b32.xlu0 %v359_v30, %s1003_s0 }
 0x1a8   :  { %v432_v41 = vpop.permute.xlu0 %431  ;;  %v318_v53 = vpop.permute.xlu1 %317 }
 0x1a9   :  { %v434_v44 = vmul.f32 %v432_v41, %v410_v42  ;;  %v320_v54 = vmul.f32 %v318_v53, %v314_v23  ;;  %v595_v53 = vld [vmem:[%s1467_s9] sm:$0xff] }
 0x1ab   :  { %v321_v56 = vadd.f32 %v320_v54, %v303_v52  ;;  %v602_v52 = vld [vmem:[%s1467_s9 + $0x38] sm:$0xff] }
 0x1ac   :  { %v606_v54 = vld [vmem:[%s1467_s9 + $0x58] sm:$0xff] }
 0x1ae   :  { %404 = vrot.lane.b32.xlu1 %v402_v38, %s1004_s28  ;;  %393 = vrot.lane.b32.xlu0 %v391_v39, %s1003_s0 }
 0x1b6   :  { %436 = vrot.lane.b32.xlu1 %v434_v44, %s1004_s28  ;;  %425 = vrot.lane.b32.xlu0 %v423_v45, %s1003_s0 }
 0x1be   :  { %510 = vperm.xlu1 %969, %v445_v46   ;;  %489 = vperm.xlu0 %968, %v443_v47   ;;  %v575_v46 = vpop.permute.xlu2 %574 }
 0x1c6   :  { %553 = vperm.xlu1 %969, %v449_v48   ;;  %542 = vperm.xlu0 %968, %v448_v49   ;;  %v599_v49 = vld [vmem:[%s1467_s9 + $0x20] sm:$0xff]  ;;  %v457_v55 = vpop.permute.xlu2 %456 }
 0x1ce   :  { %471 = vperm.xlu1 %969, %v441_v50   ;;  %585 = vperm.xlu0 %968, %v452_v51   ;;  %v597_v50 = vld [vmem:[%s1467_s9 + $0x10] sm:$0xff]  ;;  %v603_v51 = vld [vmem:[%s1467_s9 + $0x40] sm:$0xff] }
 0x210   :  { %v341_v57 = vpop.permute.xlu1 %340  ;;  %v330_v58 = vpop.permute.xlu0 %329 }
 0x211   :  { %v332_v59 = vadd.f32 %v330_v58, %v321_v56  ;;  %v504_v58 = vpop.permute.xlu2 %503 }
 0x213   :  { %v343_v60 = vadd.f32 %v341_v57, %v332_v59 }
 0x215   :  { %v353_v62 = vadd.f32 %v352_v61, %v343_v60 }
 0x218   :  { %v373_v0 = vpop.permute.xlu1 %372  ;;  %v362_v1 = vpop.permute.xlu0 %361 }
 0x219   :  { %v364_v2 = vadd.f32 %v362_v1, %v353_v62 }
 0x21b   :  { %v375_v3 = vadd.f32 %v373_v0, %v364_v2  ;;  %v536_v2 = vpop.permute.xlu2 %535 }
 0x21d   :  { %v385_v5 = vadd.f32 %v384_v4, %v375_v3 }
 0x220   :  { %v405_v6 = vpop.permute.xlu1 %404  ;;  %v394_v7 = vpop.permute.xlu0 %393 }
 0x221   :  { %v396_v8 = vadd.f32 %v394_v7, %v385_v5 }
 0x223   :  { %v407_v10 = vadd.f32 %v405_v6, %v396_v8 }
 0x225   :  { %v417_v12 = vadd.f32 %v416_v11, %v407_v10 }
 0x228   :  { %v426_v13 = vpop.permute.xlu0 %425  ;;  %v437_v15 = vpop.permute.xlu1 %436 }
 0x229   :  { %v428_v14 = vadd.f32 %v426_v13, %v417_v12  ;;  %v568_v12 = vpop.permute.xlu2 %567 }
 0x22b   :  { %v439_v16 = vadd.f32 %v437_v15, %v428_v14 }
 0x22d   :  { %v440_v17 = vmax.f32 %v439_v16, 0.0 }
 0x22f   :  { %v460_v18 = vrot.slane %v440_v17, 6  ;;  %v462_v19 = vrot.slane %v440_v17, 4  ;;  %v464_v20 = vrot.slane %v440_v17, 2 }
 0x230   :  { %v490_v25 = vpop.permute.xlu0 %489  ;;  %v511_v30 = vpop.permute.xlu1 %510 }
 0x231   :  { %v466_v22 = vsel %vm65_vm0, %v440_v17, %v460_v18  ;;  %v498_v24 = vsel %vm65_vm0, %v464_v20, %v440_v17  ;;  %v530_v35 = vsel %vm65_vm0, %v462_v19, %v464_v20  ;;  %v562_v40 = vsel %vm65_vm0, %v460_v18, %v462_v19 }
 0x232   :  { %v467_v23 = vsel %vm67_vm1, %v466_v22, %v462_v19  ;;  %v499_v29 = vsel %vm67_vm1, %v498_v24, %v460_v18  ;;  %v531_v37 = vsel %vm67_vm1, %v530_v35, %v440_v17  ;;  %v563_v43 = vsel %vm67_vm1, %v562_v40, %v464_v20  ;;  %v633_v24 = vpop.permute.xlu2 %632 }
 0x233   :  { %v468_v26 = vsel %vm69_vm2, %v467_v23, %v464_v20  ;;  %v500_v31 = vsel %vm69_vm2, %v499_v29, %v462_v19  ;;  %v532_v39 = vsel %vm69_vm2, %v531_v37, %v460_v18  ;;  %v564_v45 = vsel %vm69_vm2, %v563_v43, %v440_v17 }
 0x234   :  { %v492_v27 = vmul.f32 %v490_v25, %v468_v26  ;;  %v481_v28 = vmul.f32 %v479_v21, %v468_v26  ;;  %v513_v33 = vmul.f32 %v511_v30, %v500_v31  ;;  %v524_v34 = vmul.f32 %v522_v32, %v500_v31 }
 0x235   :  { %v577_v48 = vmul.f32 %v575_v46, %v564_v45  ;;  %v506_v0 = vmul.f32 %v504_v58, %v500_v31  ;;  %v538_v7 = vmul.f32 %v536_v2, %v532_v39  ;;  %v570_v14 = vmul.f32 %v568_v12, %v564_v45  ;;  %v757_v58 = vld [vmem:[%s1469_s11 + $0x20] sm:$0xff]  ;;  %v957_v12 = vld [vmem:[%s1469_s11 + $0xb8] sm:$0xff] }
 0x236   :  { %494 = vrot.lane.b32.xlu1 %v492_v27, %s1004_s28  ;;  %483 = vrot.lane.b32.xlu0 %v481_v28, %s1003_s0 }
 0x238   :  { %v543_v36 = vpop.permute.xlu0 %542  ;;  %v554_v38 = vpop.permute.xlu1 %553 }
 0x239   :  { %v556_v41 = vmul.f32 %v554_v38, %v532_v39  ;;  %v545_v42 = vmul.f32 %v543_v36, %v532_v39 }
 0x23a   :  { %v676_v35 = vpop.permute.xlu2 %675 }
 0x23e   :  { %526 = vrot.lane.b32.xlu1 %v524_v34, %s1004_s28  ;;  %515 = vrot.lane.b32.xlu0 %v513_v33, %s1003_s0 }
 0x240   :  { %v586_v44 = vpop.permute.xlu0 %585  ;;  %v472_v56 = vpop.permute.xlu1 %471 }
 0x241   :  { %v588_v47 = vmul.f32 %v586_v44, %v564_v45  ;;  %v474_v57 = vmul.f32 %v472_v56, %v468_v26  ;;  %v952_v56 = vld [vmem:[%s1469_s11 + $0xa0] sm:$0x3f] }
 0x242   :  { %953 = vmatpush.msk.msra.mxu2 %vm69_vm2, %v952_v56 }
 0x243   :  { %v475_v59 = vadd.f32 %v474_v57, %v457_v55  ;;  %v943_v55 = vld [vmem:[%s1469_s11 + $0x68] sm:$0x3f]  ;;  %v961_v57 = vld [vmem:[%s1469_s11 + $0xd8] sm:$0x3f] }
 0x244   :  { %944 = vmatpush.msk.msra.mxu1 %vm69_vm2, %v943_v55  ;;  %962 = vmatpush.msk.msra.mxu3 %vm69_vm2, %v961_v57 }
 0x246   :  { %558 = vrot.lane.b32.xlu1 %v556_v41, %s1004_s28  ;;  %547 = vrot.lane.b32.xlu0 %v545_v42, %s1003_s0 }
 0x24e   :  { %590 = vrot.lane.b32.xlu1 %v588_v47, %s1004_s28  ;;  %579 = vrot.lane.b32.xlu0 %v577_v48, %s1003_s0 }
 0x256   :  { %664 = vperm.xlu1 %969, %v599_v49   ;;  %643 = vperm.xlu0 %968, %v597_v50   ;;  %v729_v49 = vpop.permute.xlu2 %728 }
 0x25e   :  { %707 = vperm.xlu1 %969, %v603_v51   ;;  %696 = vperm.xlu0 %968, %v602_v52   ;;  %v611_v52 = vpop.permute.xlu2 %610 }
 0x266   :  { %625 = vperm.xlu1 %969, %v595_v53   ;;  %739 = vperm.xlu0 %968, %v606_v54   ;;  %v759_v53 = vld [vmem:[%s1469_s11 + $0x30] sm:$0x3f]  ;;  %v758_v54 = vld [vmem:[%s1469_s11 + $0x28] sm:$0xff] }
 0x267   :  { %935 = vmatpush.msk.msra.mxu0 %vm69_vm2, %v759_v53 }
 0x269   :  { %777 = vmatpush.msra.mxu0 %v758_v54 }
 0x26b   :  { %778 = vmatpush.msra.mxu0 %v757_v58 }
 0x2a8   :  { %v495_v60 = vpop.permute.xlu1 %494  ;;  %v484_v61 = vpop.permute.xlu0 %483 }
 0x2a9   :  { %v486_v62 = vadd.f32 %v484_v61, %v475_v59  ;;  %v942_v59 = vld [vmem:[%s1469_s11 + $0x60] sm:$0xff]  ;;  %v960_v61 = vld [vmem:[%s1469_s11 + $0xd0] sm:$0xff] }
 0x2aa   :  { %812 = vmatpush.msra.mxu1 %v942_v59  ;;  %882 = vmatpush.msra.mxu3 %v960_v61 }
 0x2ab   :  { %v497_v63 = vadd.f32 %v495_v60, %v486_v62  ;;  %v951_v60 = vld [vmem:[%s1469_s11 + $0x98] sm:$0xff] }
 0x2ac   :  { %v941_v62 = vld [vmem:[%s1469_s11 + $0x58] sm:$0xff]  ;;  %847 = vmatpush.msra.mxu2 %v951_v60 }
 0x2ad   :  { %v507_v1 = vadd.f32 %v506_v0, %v497_v63  ;;  %v950_v63 = vld [vmem:[%s1469_s11 + $0x90] sm:$0xff]  ;;  %v756_v0 = vld [vmem:[%s1469_s11 + $0x18] sm:$0xff]  ;;  %813 = vmatpush.msra.mxu1 %v941_v62 }
 0x2ae   :  { %848 = vmatpush.msra.mxu2 %v950_v63  ;;  %779 = vmatpush.msra.mxu0 %v756_v0 }
 0x2b0   :  { %v527_v3 = vpop.permute.xlu1 %526  ;;  %v516_v4 = vpop.permute.xlu0 %515 }
 0x2b1   :  { %v518_v5 = vadd.f32 %v516_v4, %v507_v1  ;;  %v959_v1 = vld [vmem:[%s1469_s11 + $0xc8] sm:$0xff]  ;;  %v755_v4 = vld [vmem:[%s1469_s11 + $0x10] sm:$0xff] }
 0x2b2   :  { %883 = vmatpush.msra.mxu3 %v959_v1  ;;  %780 = vmatpush.msra.mxu0 %v755_v4 }
 0x2b3   :  { %v529_v6 = vadd.f32 %v527_v3, %v518_v5  ;;  %v940_v5 = vld [vmem:[%s1469_s11 + $0x50] sm:$0xff] }
 0x2b4   :  { %814 = vmatpush.msra.mxu1 %v940_v5 }
 0x2b5   :  { %v539_v8 = vadd.f32 %v538_v7, %v529_v6  ;;  %v949_v6 = vld [vmem:[%s1469_s11 + $0x88] sm:$0xff]  ;;  %v958_v7 = vld [vmem:[%s1469_s11 + $0xc0] sm:$0xff] }
 0x2b6   :  { %849 = vmatpush.msra.mxu2 %v949_v6  ;;  %884 = vmatpush.msra.mxu3 %v958_v7 }
 0x2b8   :  { %v559_v9 = vpop.permute.xlu1 %558  ;;  %v548_v10 = vpop.permute.xlu0 %547  ;;  %885 = vmatpush.msra.mxu3 %v957_v12 }
 0x2b9   :  { %v550_v11 = vadd.f32 %v548_v10, %v539_v8  ;;  %v658_v8 = vpop.permute.xlu2 %657  ;;  %v939_v10 = vld [vmem:[%s1469_s11 + $0x48] sm:$0xff] }
 0x2ba   :  { %815 = vmatpush.msra.mxu1 %v939_v10 }
 0x2bb   :  { %v561_v13 = vadd.f32 %v559_v9, %v550_v11  ;;  %v754_v9 = vld [vmem:[%s1469_s11 + $0x8] sm:$0xff]  ;;  %v948_v11 = vld [vmem:[%s1469_s11 + $0x80] sm:$0xff] }
 0x2bc   :  { %781 = vmatpush.msra.mxu0 %v754_v9  ;;  %850 = vmatpush.msra.mxu2 %v948_v11 }
 0x2bd   :  { %v571_v15 = vadd.f32 %v570_v14, %v561_v13  ;;  %v753_v13 = vld [vmem:[%s1469_s11] sm:$0xff] }
 0x2be   :  { %v938_v14 = vld [vmem:[%s1469_s11 + $0x40] sm:$0xff]  ;;  %782 = vmatpush.msra.mxu0 %v753_v13 }
 0x2bf   :  { %816 = vmatpush.msra.mxu1 %v938_v14 }
 0x2c0   :  { %v580_v16 = vpop.permute.xlu0 %579  ;;  %v591_v18 = vpop.permute.xlu1 %590 }
 0x2c1   :  { %v582_v17 = vadd.f32 %v580_v16, %v571_v15  ;;  %v947_v16 = vld [vmem:[%s1469_s11 + $0x78] sm:$0xff] }
 0x2c2   :  { %851 = vmatpush.msra.mxu2 %v947_v16 }
 0x2c3   :  { %v593_v19 = vadd.f32 %v591_v18, %v582_v17  ;;  %v956_v17 = vld [vmem:[%s1469_s11 + $0xb0] sm:$0xff]  ;;  %v937_v18 = vld [vmem:[%s1469_s11 + $0x38] sm:$0xff] }
 0x2c4   :  { %886 = vmatpush.msra.mxu3 %v956_v17  ;;  %817 = vmatpush.msra.mxu1 %v937_v18 }
 0x2c5   :  { %v594_v20 = vmax.f32 %v593_v19, 0.0 }
 0x2c7   :  { %v614_v21 = vrot.slane %v594_v20, 6  ;;  %v616_v22 = vrot.slane %v594_v20, 4  ;;  %v618_v23 = vrot.slane %v594_v20, 2 }
 0x2c8   :  { %v644_v28 = vpop.permute.xlu0 %643  ;;  %v665_v33 = vpop.permute.xlu1 %664 }
 0x2c9   :  { %v620_v25 = vsel %vm65_vm0, %v594_v20, %v614_v21  ;;  %v652_v27 = vsel %vm65_vm0, %v618_v23, %v594_v20  ;;  %v684_v38 = vsel %vm65_vm0, %v616_v22, %v618_v23  ;;  %v716_v43 = vsel %vm65_vm0, %v614_v21, %v616_v22 }
 0x2ca   :  { %v621_v26 = vsel %vm67_vm1, %v620_v25, %v616_v22  ;;  %v653_v32 = vsel %vm67_vm1, %v652_v27, %v614_v21  ;;  %v685_v40 = vsel %vm67_vm1, %v684_v38, %v594_v20  ;;  %v717_v46 = vsel %vm67_vm1, %v716_v43, %v618_v23  ;;  %v690_v27 = vpop.permute.xlu2 %689 }
 0x2cb   :  { %v622_v29 = vsel %vm69_vm2, %v621_v26, %v618_v23  ;;  %v1334_v34 = vsel %vm69_vm2, %v653_v32, %v616_v22  ;;  %v1343_v42 = vsel %vm69_vm2, %v685_v40, %v614_v21  ;;  %v1352_v48 = vsel %vm69_vm2, %v717_v46, %v594_v20  ;;  %v946_v21 = vld [vmem:[%s1469_s11 + $0x70] sm:$0xff]  ;;  %v955_v22 = vld [vmem:[%s1469_s11 + $0xa8] sm:$0xff] }
 0x2cc   :  { %v646_v30 = vmul.f32 %v644_v28, %v622_v29  ;;  %v635_v31 = vmul.f32 %v633_v24, %v622_v29  ;;  %v667_v36 = vmul.f32 %v665_v33, %v1334_v34  ;;  %v678_v37 = vmul.f32 %v676_v35, %v1334_v34  ;;  %852 = vmatpush.msra.mxu2 %v946_v21 }
 0x2cd   :  { %v731_v51 = vmul.f32 %v729_v49, %v1352_v48  ;;  %v660_v25 = vmul.f32 %v658_v8, %v1334_v34  ;;  %887 = vmatpush.msra.mxu3 %v955_v22  ;;  %v692_v32 = vmul.f32 %v690_v27, %v1343_v42 }
 0x2ce   :  { %648 = vrot.lane.b32.xlu1 %v646_v30, %s1004_s28  ;;  %637 = vrot.lane.b32.xlu0 %v635_v31, %s1003_s0 }
 0x2d0   :  { %v697_v39 = vpop.permute.xlu0 %696  ;;  %v708_v41 = vpop.permute.xlu1 %707 }
 0x2d1   :  { %v710_v44 = vmul.f32 %v708_v41, %v1343_v42  ;;  %v699_v45 = vmul.f32 %v697_v39, %v1343_v42  ;;  %v971_v42 = vld [vmem:[%s1470_s12] ss:$0 sm:$0xff]  ;;  %s1005_s12 = smov [#allocation2]  }
 0x2d2   :  { %v722_v38 = vpop.permute.xlu2 %721  ;;  %s924_s8 = sshll.u32 %s1005_s12, 4  ;;  %s925_s8 = int_to_ptr.vmem [resolvable:$true] %s924_s8 }
 0x2d3   :  { %v724_v40 = vmul.f32 %v722_v38, %v1352_v48 }
 0x2d6   :  { %680 = vrot.lane.b32.xlu1 %v678_v37, %s1004_s28  ;;  %669 = vrot.lane.b32.xlu0 %v667_v36, %s1003_s0 }
 0x2d8   :  { %v740_v47 = vpop.permute.xlu0 %739  ;;  %v626_v2 = vpop.permute.xlu1 %625 }
 0x2d9   :  { %v742_v50 = vmul.f32 %v740_v47, %v1352_v48  ;;  %v628_v3 = vmul.f32 %v626_v2, %v622_v29 }
 0x2db   :  { %v629_v15 = vadd.f32 %v628_v3, %v611_v52 }
 0x2de   :  { %712 = vrot.lane.b32.xlu1 %v710_v44, %s1004_s28  ;;  %701 = vrot.lane.b32.xlu0 %v699_v45, %s1003_s0 }
 0x2e6   :  { %744 = vrot.lane.b32.xlu1 %v742_v50, %s1004_s28  ;;  %733 = vrot.lane.b32.xlu0 %v731_v51, %s1003_s0 }
 0x340   :  { %v649_v19 = vpop.permute.xlu1 %648  ;;  %v638_v20 = vpop.permute.xlu0 %637 }
 0x341   :  { %v640_v23 = vadd.f32 %v638_v20, %v629_v15 }
 0x343   :  { %v651_v24 = vadd.f32 %v649_v19, %v640_v23 }
 0x345   :  { %v661_v26 = vadd.f32 %v660_v25, %v651_v24 }
 0x348   :  { %v681_v28 = vpop.permute.xlu1 %680  ;;  %v670_v29 = vpop.permute.xlu0 %669 }
 0x349   :  { %v672_v30 = vadd.f32 %v670_v29, %v661_v26 }
 0x34b   :  { %v683_v31 = vadd.f32 %v681_v28, %v672_v30 }
 0x34d   :  { %v693_v33 = vadd.f32 %v692_v32, %v683_v31 }
 0x350   :  { %v713_v35 = vpop.permute.xlu1 %712  ;;  %v702_v36 = vpop.permute.xlu0 %701 }
 0x351   :  { %v704_v37 = vadd.f32 %v702_v36, %v693_v33 }
 0x353   :  { %v715_v39 = vadd.f32 %v713_v35, %v704_v37 }
 0x355   :  { %v725_v41 = vadd.f32 %v724_v40, %v715_v39 }
 0x358   :  { %v734_v34 = vpop.permute.xlu0 %733  ;;  %v745_v44 = vpop.permute.xlu1 %744 }
 0x359   :  { %v736_v43 = vadd.f32 %v734_v34, %v725_v41 }
 0x35b   :  { %v747_v45 = vadd.f32 %v745_v44, %v736_v43 }
 0x35d   :  { %v748_v46 = vmax.f32 %v747_v45, 0.0 }
 0x35f   :  { %936 = vmatmul.msk.f32.vlgmr.msra.gmra.mxu0 %vm760_vm3, %v748_v46  ;;  %v796_v47 = vrot.slane %v748_v46, 2  ;;  %v831_v49 = vrot.slane %v748_v46, 4  ;;  %v866_v50 = vrot.slane %v748_v46, 6 }
 0x361   :  { %945 = vmatmul.msk.f32.vlgmr.msra.gmra.mxu1 %vm760_vm3, %v796_v47  ;;  %954 = vmatmul.msk.f32.vlgmr.msra.gmra.mxu2 %vm760_vm3, %v831_v49 }
 0x362   :  { %963 = vmatmul.msk.f32.vlgmr.msra.gmra.mxu3 %vm760_vm3, %v866_v50 }
 0x3dc   :  { %v784_v51 = vpop.f32.mrf.mxu0 }
 0x3dd   :  { %v787_v48 = vadd.f32 %v971_v42, %v784_v51 }
 0x3de   :  { %v819_v52 = vpop.f32.mrf.mxu1 }
 0x3df   :  { %v822_v53 = vadd.f32 %v819_v52, %v787_v48 }
 0x3e4   :  { %v854_v54 = vpop.f32.mrf.mxu2 }
 0x3e5   :  { %v857_v55 = vadd.f32 %v854_v54, %v822_v53  ;;  %v889_v56 = vpop.f32.mrf.mxu3 }
 0x3e7   :  { %v892_v57 = vadd.f32 %v889_v56, %v857_v55 }
 0x3e9   :  { %v894_v58 = vsel %vm893_vm4, %v892_v57, -inf }
 0x3ea   :  { %895 = vmax.xlane.f32.xlu2 %v894_v58 }
 0x45d   :  { %v896_v59 = vpop.xlane.xlu2 %895 }
 0x45e   :  { %v897_v60 = vsub.f32 %v892_v57, %v896_v59 }
 0x460   :  { %v898_v61 = vmul.f32 1.442695, %v897_v60 }
 0x462   :  { %972 = vpow2.f32 %v898_v61 }
 0x468   :  { %v973_v62 = vpop.eup %972 }
 0x469   :  { %v900_v63 = vsel %vm893_vm4, %v973_v62, 0.0 }
 0x46a   :  { %901 = vadd.xlane.f32.xlu0 %v900_v63 }
 0x4dd   :  { %v902_v0 = vpop.xlane.xlu0 %901 }
 0x4de   :  { %974 = vrcp.f32 %v902_v0  ;;  %v914_v4 = vand.u32 2147483648, %v902_v0  ;;  %v912_v6 = vand.u32 2147483647, %v902_v0  ;;  %vm908_vm6 = vweird.f32 %v902_v0 }
 0x4e0   :  { %v915_v8 = vor.u32 1.1754944e-38, %v914_v4  ;;  %vm913_vm8 = vcmp.eq.f32.partialorder %v912_v6, 8.507059e+37 }
 0x4e4   :  { %v975_v1 = vpop.eup %974 }
 0x4e5   :  { %v904_v2 = vmul.f32 %v975_v1, %v902_v0  ;;  %vm909_vm5 = vweird.f32 %v975_v1 }
 0x4e6   :  { %vm910_vm7 = vmor %vm908_vm6, %vm909_vm5 }
 0x4e7   :  { %v905_v3 = vsub.f32 1.0, %v904_v2 }
 0x4e9   :  { %v906_v5 = vmul.f32 %v975_v1, %v905_v3 }
 0x4eb   :  { %v907_v7 = vadd.f32 %v975_v1, %v906_v5 }
 0x4ed   :  { %v911_v9 = vsel %vm910_vm7, %v975_v1, %v907_v7 }
 0x4ee   :  { %v916_v10 = vsel %vm913_vm8, %v915_v8, %v911_v9 }
 0x4ef   :  { %v917_v11 = vmul.f32 %v973_v62, %v916_v10 }
 0x4f1   :  { %918 = vst.msk [vmem:[#allocation2] sm:$0x3] %vm893_vm4, %v917_v11 }
 0x4f2   :  { %929 = dma.vmem_to_hbm [thread:$0]  %s925_s8, 32, %s927_s20, [#allocation3]  }
 0x4f3   :  { %1000 = dma.done.wait [#allocation3], 32  }
 0x4f4   :  { %1001 = vsyncadd [#allocation3], 4294967264 }
 0x4f5   :  { %934 = vsyncpa [#allocation3], 1 }

</bundles_post_ra>
